<compile_context>
chip_gen: v7x
topology: tpu7x:2x2x1
jax: 0.10.0
libtpu: 0.0.40
codegen_flags: <defaults>
</compile_context>

<pallas_src>
import math
from functools import partial

import jax
import jax.numpy as jnp
from jax import lax
from jax.experimental import pallas as pl
from jax.experimental.pallas import tpu as pltpu

LANE = 128
SUBLANE = 8


def _round_up(x, m):
    return (x + m - 1) // m * m


def _layernorm(x, g, b, eps=1e-5):
    # x: (M, C); g, b: (1, C). Matches torch.nn.LayerNorm (biased var, eps=1e-5).
    mu = jnp.mean(x, axis=-1, keepdims=True)
    xc = x - mu
    var = jnp.mean(xc * xc, axis=-1, keepdims=True)
    return xc * lax.rsqrt(var + eps) * g + b


def _gelu_exact(x):
    # torch.nn.GELU default = exact erf-based GELU (kept for torch parity).
    return 0.5 * x * (1.0 + lax.erf(x * (1.0 / math.sqrt(2.0))))


def multiscale_block_kernel(
    x_ref,                     # (N_pad, C)        f32 activations, one batch
    n1g_ref, n1b_ref,          # (1, C)            norm1 gamma/beta
    wq_ref, wk_ref, wv_ref,    # (H, C, hd)        bf16 head-major qkv (scale in wq)
    wo_ref,                    # (H, hd, C)        bf16 attn out-proj, head-blocked
    bo_ref,                    # (1, C)            attn out-proj bias
    n2g_ref, n2b_ref,          # (1, C)            norm2 gamma/beta
    w1_ref, b1_ref,            # (C, Hid) bf16, (1, Hid)
    w2p_ref, b2p_ref,          # (Hid+C, Cpad) bf16 fused [fc2;proj], (1, Cpad)
    out_ref,                   # (N_pad, Cpad)     f32, lane-dense
    *, n_valid, num_heads,
):
    x = x_ref[...]                                    # (N_pad, C)
    Np, C = x.shape
    H = num_heads

    # ---- norm1 (f32 statistics) ----
    xn = _layernorm(x, n1g_ref[...], n1b_ref[...])

    # ---- head-batched q/k/v: (H, Np, C) @ (H, C, hd) -> (H, Np, hd) ----
    # Broadcast along a new leading head axis (layout preserving) instead of
    # lane-slicing hd-wide columns out of a fused qkv activation.
    xn_h = jnp.broadcast_to(xn.astype(jnp.bfloat16)[None], (H, Np, C))
    dn_proj = (((2,), (1,)), ((0,), (0,)))
    q = lax.dot_general(xn_h, wq_ref[...], dn_proj, preferred_element_type=jnp.float32)
    k = lax.dot_general(xn_h, wk_ref[...], dn_proj, preferred_element_type=jnp.float32)
    v = lax.dot_general(xn_h, wv_ref[...], dn_proj, preferred_element_type=jnp.float32)

    # ---- attention scores (softmax scale already folded into wq) ----
    s = lax.dot_general(q.astype(jnp.bfloat16), k.astype(jnp.bfloat16),
                        (((2,), (2,)), ((0,), (0,))),
                        preferred_element_type=jnp.float32)          # (H, Np, Np)
    col = lax.broadcasted_iota(jnp.int32, s.shape, 2)
    s = jnp.where(col < n_valid, s, -1e30)                           # mask pad keys
    s = s - jnp.max(s, axis=-1, keepdims=True)
    p = jnp.exp(s)
    p = p * pl.reciprocal(jnp.sum(p, axis=-1, keepdims=True), approx=True)

    o = lax.dot_general(p.astype(jnp.bfloat16), v.astype(jnp.bfloat16),
                        (((2,), (1,)), ((0,), (0,))),
                        preferred_element_type=jnp.float32)          # (H, Np, hd)

    # ---- head recombination folded into the out-projection:
    # sum_h o_h @ Wo[h*hd:(h+1)*hd, :]  ==  lane-concat(o_h) @ Wo (no concat).
    contrib = lax.dot_general(o.astype(jnp.bfloat16), wo_ref[...],
                              (((2,), (1,)), ((0,), (0,))),
                              preferred_element_type=jnp.float32)    # (H, Np, C)
    x_block = jnp.sum(contrib, axis=0) + bo_ref[...]                 # (Np, C)

    # ---- skip path: pool_skip is an identity 1x1x1 MaxPool3d -> x_res == x ----
    x1 = x + x_block

    # ---- norm2 + MLP; fc2 and channel projection fused into one matmul ----
    xn2 = _layernorm(x1, n2g_ref[...], n2b_ref[...])
    xn2_b = xn2.astype(jnp.bfloat16)
    h1 = jnp.dot(xn2_b, w1_ref[...], preferred_element_type=jnp.float32) + b1_ref[...]
    h1 = _gelu_exact(h1)
    tail = jnp.concatenate([h1.astype(jnp.bfloat16), xn2_b], axis=-1)  # (Np, Hid+C)
    out_ref[...] = (jnp.dot(tail, w2p_ref[...], preferred_element_type=jnp.float32)
                    + b2p_ref[...])


def multiscale_block(x, params, num_heads):
    B, N, C = x.shape
    H = num_heads
    hd = C // H
    Hid = params["fc1_w"].shape[1]
    Cout = params["proj_w"].shape[1]
    scale = hd ** (-0.5)

    N_pad = _round_up(N, SUBLANE)
    Cpad = _round_up(Cout, LANE)

    # Head-major qkv weights; softmax scale folded into Q (exact, qkv has no bias).
    wqkv = params["qkv_w"]                                             # (C, 3C)
    wq = (wqkv[:, :C] * scale).reshape(C, H, hd).transpose(1, 0, 2).astype(jnp.bfloat16)
    wk = wqkv[:, C:2 * C].reshape(C, H, hd).transpose(1, 0, 2).astype(jnp.bfloat16)
    wv = wqkv[:, 2 * C:].reshape(C, H, hd).transpose(1, 0, 2).astype(jnp.bfloat16)
    wo = params["attn_proj_w"].reshape(H, hd, C).astype(jnp.bfloat16)  # (H, hd, C)

    w1 = params["fc1_w"].astype(jnp.bfloat16)                          # (C, Hid)

    # Fused [fc2 ; proj] weight, zero-padded to a lane-dense (…, Cpad) output.
    pad_cols = lambda w: jnp.pad(w, ((0, 0), (0, Cpad - Cout)))
    w2p = jnp.concatenate([pad_cols(params["fc2_w"]), pad_cols(params["proj_w"])],
                          axis=0).astype(jnp.bfloat16)                 # (Hid+C, Cpad)
    b2p = pad_cols(params["fc2_b"] + params["proj_b"])                 # (1, Cpad) f32

    # Pad sequence to a multiple of 8 sublanes; pad rows are zeros (masked keys).
    x_pad = jnp.pad(x, ((0, 0), (0, N_pad - N), (0, 0)))               # (B, N_pad, C)

    kernel = partial(multiscale_block_kernel, n_valid=N, num_heads=H)

    def rep(ndim):
        return lambda b: (0,) * ndim

    in_specs = [
        pl.BlockSpec((None, N_pad, C), lambda b: (b, 0, 0)),           # x (per batch)
        pl.BlockSpec((1, C), rep(2)), pl.BlockSpec((1, C), rep(2)),    # norm1 g/b
        pl.BlockSpec((H, C, hd), rep(3)),                              # wq
        pl.BlockSpec((H, C, hd), rep(3)),                              # wk
        pl.BlockSpec((H, C, hd), rep(3)),                              # wv
        pl.BlockSpec((H, hd, C), rep(3)),                              # wo
        pl.BlockSpec((1, C), rep(2)),                                  # bo
        pl.BlockSpec((1, C), rep(2)), pl.BlockSpec((1, C), rep(2)),    # norm2 g/b
        pl.BlockSpec((C, Hid), rep(2)), pl.BlockSpec((1, Hid), rep(2)),   # fc1
        pl.BlockSpec((Hid + C, Cpad), rep(2)), pl.BlockSpec((1, Cpad), rep(2)),  # fused
    ]
    out_spec = pl.BlockSpec((None, N_pad, Cpad), lambda b: (b, 0, 0))

    args = (
        x_pad,
        params["norm1_g"], params["norm1_b"],
        wq, wk, wv, wo, params["attn_proj_b"],
        params["norm2_g"], params["norm2_b"],
        w1, params["fc1_b"],
        w2p, b2p,
    )

    flops = 2 * B * (N_pad * C * 3 * C                 # q/k/v projections
                     + 2 * H * N_pad * N_pad * hd      # scores + attn@v
                     + H * N_pad * hd * C              # out-projection
                     + N_pad * C * Hid                 # fc1
                     + N_pad * (Hid + C) * Cpad)       # fused fc2+proj
    transcendentals = B * (H * N_pad * N_pad + N_pad * Hid + 4 * N_pad)
    bytes_accessed = (sum(int(a.size) * a.dtype.itemsize for a in args)
                      + B * N_pad * Cpad * 4)

    out = pl.pallas_call(
        kernel,
        out_shape=jax.ShapeDtypeStruct((B, N_pad, Cpad), jnp.float32),
        grid_spec=pltpu.PrefetchScalarGridSpec(
            num_scalar_prefetch=0,
            grid=(B,),
            in_specs=in_specs,
            out_specs=out_spec,
        ),
        compiler_params=pltpu.CompilerParams(
            dimension_semantics=("parallel",),
            vmem_limit_bytes=32 * 1024 * 1024,
        ),
        cost_estimate=pl.CostEstimate(flops=flops,
                                      transcendentals=transcendentals,
                                      bytes_accessed=bytes_accessed),
    )(*args)

    return out[:, :N, :Cout]


def reference(x, params, num_heads):
    # Pure-JAX f32 reference of MultiScaleBlock.forward under the default config.
    def ln(t, g, b, eps=1e-5):
        mu = t.mean(-1, keepdims=True)
        var = ((t - mu) ** 2).mean(-1, keepdims=True)
        return (t - mu) / jnp.sqrt(var + eps) * g + b

    B, N, C = x.shape
    hd = C // num_heads
    xn = ln(x, params["norm1_g"], params["norm1_b"])
    qkv = xn @ params["qkv_w"]
    q = qkv[..., :C].reshape(B, N, num_heads, hd).transpose(0, 2, 1, 3)
    k = qkv[..., C:2 * C].reshape(B, N, num_heads, hd).transpose(0, 2, 1, 3)
    v = qkv[..., 2 * C:].reshape(B, N, num_heads, hd).transpose(0, 2, 1, 3)
    s = jnp.einsum("bhnd,bhmd->bhnm", q, k) * hd ** (-0.5)
    a = jax.nn.softmax(s, axis=-1)
    o = jnp.einsum("bhnm,bhmd->bhnd", a, v).transpose(0, 2, 1, 3).reshape(B, N, C)
    x_block = o @ params["attn_proj_w"] + params["attn_proj_b"]
    x1 = x + x_block                      # pool_skip identity
    xn2 = ln(x1, params["norm2_g"], params["norm2_b"])
    h = jax.nn.gelu(xn2 @ params["fc1_w"] + params["fc1_b"], approximate=False)
    x_mlp = h @ params["fc2_w"] + params["fc2_b"]
    x_proj = xn2 @ params["proj_w"] + params["proj_b"]
    return x_proj + x_mlp


if __name__ == "__main__":
    # Module hyper-parameters (small, consistent with MultiScaleBlock.__init__ defaults).
    dim, dim_out, num_heads, mlp_ratio = 32, 64, 4, 4.0
    hidden = int(dim * mlp_ratio)
    B = 2
    thw_shape = (1, 4, 4)                                 # T, H, W
    N = 1 + thw_shape[0] * thw_shape[1] * thw_shape[2]    # cls token + tokens = 17

    key = jax.random.PRNGKey(0)
    kx, k0, k1, k2, k3, k4 = jax.random.split(key, 6)

    params = {
        "norm1_g": jnp.ones((1, dim), jnp.float32),
        "norm1_b": jnp.zeros((1, dim), jnp.float32),
        "qkv_w": 0.02 * jax.random.normal(k0, (dim, 3 * dim), jnp.float32),
        "attn_proj_w": 0.02 * jax.random.normal(k1, (dim, dim), jnp.float32),
        "attn_proj_b": jnp.zeros((1, dim), jnp.float32),
        "norm2_g": jnp.ones((1, dim), jnp.float32),
        "norm2_b": jnp.zeros((1, dim), jnp.float32),
        "fc1_w": 0.02 * jax.random.normal(k2, (dim, hidden), jnp.float32),
        "fc1_b": jnp.zeros((1, hidden), jnp.float32),
        "fc2_w": 0.02 * jax.random.normal(k3, (hidden, dim_out), jnp.float32),
        "fc2_b": jnp.zeros((1, dim_out), jnp.float32),
        "proj_w": 0.02 * jax.random.normal(k4, (dim, dim_out), jnp.float32),
        "proj_b": jnp.zeros((1, dim_out), jnp.float32),
    }

    x = jax.random.normal(kx, (B, N, dim), jnp.float32)

    out = multiscale_block(x, params, num_heads)
    out = jax.block_until_ready(out)
    thw_shape_new = thw_shape                             # no q-pooling -> unchanged

    ref = jax.block_until_ready(reference(x, params, num_heads))
    assert out.shape == (B, N, dim_out)
    assert jnp.allclose(out, ref, atol=1e-2, rtol=1e-2), "Pallas output mismatch vs reference"

    print("KERNEL_OK")
</pallas_src>

<mosaic_0001>
module attributes {stable_mosaic.version = 11 : i64} {
  func.func @multiscale_block_kernel(%arg0: i32, %arg1: memref<1x24x32xf32, #tpu.memory_space<vmem>>, %arg2: memref<1x32xf32, #tpu.memory_space<vmem>>, %arg3: memref<1x32xf32, #tpu.memory_space<vmem>>, %arg4: memref<4x32x8xbf16, #tpu.memory_space<vmem>>, %arg5: memref<4x32x8xbf16, #tpu.memory_space<vmem>>, %arg6: memref<4x32x8xbf16, #tpu.memory_space<vmem>>, %arg7: memref<4x8x32xbf16, #tpu.memory_space<vmem>>, %arg8: memref<1x32xf32, #tpu.memory_space<vmem>>, %arg9: memref<1x32xf32, #tpu.memory_space<vmem>>, %arg10: memref<1x32xf32, #tpu.memory_space<vmem>>, %arg11: memref<32x128xbf16, #tpu.memory_space<vmem>>, %arg12: memref<1x128xf32, #tpu.memory_space<vmem>>, %arg13: memref<160x128xbf16, #tpu.memory_space<vmem>>, %arg14: memref<1x128xf32, #tpu.memory_space<vmem>>, %arg15: memref<1x24x128xf32, #tpu.memory_space<vmem>>) attributes {dimension_semantics = [#tpu.dimension_semantics<parallel>], iteration_bounds = array<i64: 2>, scalar_prefetch = 0 : i64, scratch_operands = 0 : i64, tpu.core_type = #tpu.core_type<tc>, window_params = [{transform_indices = @transform_0, window_bounds = array<i64: 1, 24, 32>}, {pipeline_mode = #tpu.pipeline_mode<synchronous>, transform_indices = @transform_1, window_bounds = array<i64: 1, 32>}, {pipeline_mode = #tpu.pipeline_mode<synchronous>, transform_indices = @transform_2, window_bounds = array<i64: 1, 32>}, {pipeline_mode = #tpu.pipeline_mode<synchronous>, transform_indices = @transform_3, window_bounds = array<i64: 4, 32, 8>}, {pipeline_mode = #tpu.pipeline_mode<synchronous>, transform_indices = @transform_4, window_bounds = array<i64: 4, 32, 8>}, {pipeline_mode = #tpu.pipeline_mode<synchronous>, transform_indices = @transform_5, window_bounds = array<i64: 4, 32, 8>}, {pipeline_mode = #tpu.pipeline_mode<synchronous>, transform_indices = @transform_6, window_bounds = array<i64: 4, 8, 32>}, {pipeline_mode = #tpu.pipeline_mode<synchronous>, transform_indices = @transform_7, window_bounds = array<i64: 1, 32>}, {pipeline_mode = #tpu.pipeline_mode<synchronous>, transform_indices = @transform_8, window_bounds = array<i64: 1, 32>}, {pipeline_mode = #tpu.pipeline_mode<synchronous>, transform_indices = @transform_9, window_bounds = array<i64: 1, 32>}, {pipeline_mode = #tpu.pipeline_mode<synchronous>, transform_indices = @transform_10, window_bounds = array<i64: 32, 128>}, {pipeline_mode = #tpu.pipeline_mode<synchronous>, transform_indices = @transform_11, window_bounds = array<i64: 1, 128>}, {pipeline_mode = #tpu.pipeline_mode<synchronous>, transform_indices = @transform_12, window_bounds = array<i64: 160, 128>}, {pipeline_mode = #tpu.pipeline_mode<synchronous>, transform_indices = @transform_13, window_bounds = array<i64: 1, 128>}, {transform_indices = @transform_14, window_bounds = array<i64: 1, 24, 128>}]} {
    %c0 = arith.constant 0 : index
    %c0_0 = arith.constant 0 : index
    %c0_1 = arith.constant 0 : index
    %0 = vector.load %arg1[%c0, %c0_0, %c0_1] : memref<1x24x32xf32, #tpu.memory_space<vmem>>, vector<1x24x32xf32>
    %1 = vector.shape_cast %0 : vector<1x24x32xf32> to vector<24x32xf32>
    %c0_2 = arith.constant 0 : index
    %c0_3 = arith.constant 0 : index
    %2 = vector.load %arg2[%c0_2, %c0_3] : memref<1x32xf32, #tpu.memory_space<vmem>>, vector<1x32xf32>
    %c0_4 = arith.constant 0 : index
    %c0_5 = arith.constant 0 : index
    %3 = vector.load %arg3[%c0_4, %c0_5] : memref<1x32xf32, #tpu.memory_space<vmem>>, vector<1x32xf32>
    %cst = arith.constant dense<0.000000e+00> : vector<24xf32>
    %4 = vector.multi_reduction <add>, %1, %cst [1] : vector<24x32xf32> to vector<24xf32>
    %5 = vector.shape_cast %4 : vector<24xf32> to vector<24x1xf32>
    %cst_6 = arith.constant 3.200000e+01 : f32
    %6 = vector.broadcast %cst_6 : f32 to vector<24x1xf32>
    %7 = arith.divf %5, %6 : vector<24x1xf32>
    %8 = vector.broadcast %7 : vector<24x1xf32> to vector<24x32xf32>
    %9 = arith.subf %1, %8 : vector<24x32xf32>
    %10 = arith.mulf %9, %9 : vector<24x32xf32>
    %cst_7 = arith.constant dense<0.000000e+00> : vector<24xf32>
    %11 = vector.multi_reduction <add>, %10, %cst_7 [1] : vector<24x32xf32> to vector<24xf32>
    %12 = vector.shape_cast %11 : vector<24xf32> to vector<24x1xf32>
    %cst_8 = arith.constant 3.200000e+01 : f32
    %13 = vector.broadcast %cst_8 : f32 to vector<24x1xf32>
    %14 = arith.divf %12, %13 : vector<24x1xf32>
    %cst_9 = arith.constant 9.99999974E-6 : f32
    %15 = vector.broadcast %cst_9 : f32 to vector<24x1xf32>
    %16 = arith.addf %14, %15 : vector<24x1xf32>
    %17 = math.rsqrt %16 : vector<24x1xf32>
    %18 = vector.broadcast %17 : vector<24x1xf32> to vector<24x32xf32>
    %19 = arith.mulf %9, %18 : vector<24x32xf32>
    %20 = vector.broadcast %2 : vector<1x32xf32> to vector<24x32xf32>
    %21 = arith.mulf %19, %20 : vector<24x32xf32>
    %22 = vector.broadcast %3 : vector<1x32xf32> to vector<24x32xf32>
    %23 = arith.addf %21, %22 : vector<24x32xf32>
    %24 = arith.truncf %23 : vector<24x32xf32> to vector<24x32xbf16>
    %25 = vector.shape_cast %24 : vector<24x32xbf16> to vector<1x24x32xbf16>
    %26 = vector.shape_cast %25 : vector<1x24x32xbf16> to vector<1x24x32xbf16>
    %27 = vector.broadcast %26 : vector<1x24x32xbf16> to vector<4x24x32xbf16>
    %c0_10 = arith.constant 0 : index
    %c0_11 = arith.constant 0 : index
    %c0_12 = arith.constant 0 : index
    %28 = vector.load %arg4[%c0_10, %c0_11, %c0_12] : memref<4x32x8xbf16, #tpu.memory_space<vmem>>, vector<4x32x8xbf16>
    %cst_13 = arith.constant dense<0.000000e+00> : vector<4x24x8xf32>
    %29 = tpu.matmul %27, %28, %cst_13 {dimension_numbers = #tpu.dot_dimension_numbers<[2], [1], [1], [2], [0, 0, 0, 1, 1, 2], [0], [0]>} : vector<4x24x32xbf16>, vector<4x32x8xbf16>, vector<4x24x8xf32> -> vector<4x24x8xf32>
    %c0_14 = arith.constant 0 : index
    %c0_15 = arith.constant 0 : index
    %c0_16 = arith.constant 0 : index
    %30 = vector.load %arg5[%c0_14, %c0_15, %c0_16] : memref<4x32x8xbf16, #tpu.memory_space<vmem>>, vector<4x32x8xbf16>
    %cst_17 = arith.constant dense<0.000000e+00> : vector<4x24x8xf32>
    %31 = tpu.matmul %27, %30, %cst_17 {dimension_numbers = #tpu.dot_dimension_numbers<[2], [1], [1], [2], [0, 0, 0, 1, 1, 2], [0], [0]>} : vector<4x24x32xbf16>, vector<4x32x8xbf16>, vector<4x24x8xf32> -> vector<4x24x8xf32>
    %c0_18 = arith.constant 0 : index
    %c0_19 = arith.constant 0 : index
    %c0_20 = arith.constant 0 : index
    %32 = vector.load %arg6[%c0_18, %c0_19, %c0_20] : memref<4x32x8xbf16, #tpu.memory_space<vmem>>, vector<4x32x8xbf16>
    %cst_21 = arith.constant dense<0.000000e+00> : vector<4x24x8xf32>
    %33 = tpu.matmul %27, %32, %cst_21 {dimension_numbers = #tpu.dot_dimension_numbers<[2], [1], [1], [2], [0, 0, 0, 1, 1, 2], [0], [0]>} : vector<4x24x32xbf16>, vector<4x32x8xbf16>, vector<4x24x8xf32> -> vector<4x24x8xf32>
    %34 = arith.truncf %29 : vector<4x24x8xf32> to vector<4x24x8xbf16>
    %35 = arith.truncf %31 : vector<4x24x8xf32> to vector<4x24x8xbf16>
    %cst_22 = arith.constant dense<0.000000e+00> : vector<4x24x24xf32>
    %36 = tpu.matmul %34, %35, %cst_22 {dimension_numbers = #tpu.dot_dimension_numbers<[2], [2], [1], [1], [0, 0, 0, 1, 1, 1], [0], [0]>} : vector<4x24x8xbf16>, vector<4x24x8xbf16>, vector<4x24x24xf32> -> vector<4x24x24xf32>
    %37 = tpu.iota {dimensions = array<i32: 2>} : vector<4x24x24xi32>
    %c17_i32 = arith.constant 17 : i32
    %38 = vector.broadcast %c17_i32 : i32 to vector<4x24x24xi32>
    %39 = arith.cmpi slt, %37, %38 : vector<4x24x24xi32>
    %cst_23 = arith.constant -1.000000e+30 : f32
    %40 = vector.broadcast %cst_23 : f32 to vector<4x24x24xf32>
    %41 = arith.select %39, %36, %40 : vector<4x24x24xi1>, vector<4x24x24xf32>
    %cst_24 = arith.constant dense<0xFF800000> : vector<4x24xf32>
    %42 = vector.multi_reduction <maximumf>, %41, %cst_24 [2] : vector<4x24x24xf32> to vector<4x24xf32>
    %43 = vector.shape_cast %42 : vector<4x24xf32> to vector<4x24x1xf32>
    %44 = vector.broadcast %43 : vector<4x24x1xf32> to vector<4x24x24xf32>
    %45 = arith.subf %41, %44 : vector<4x24x24xf32>
    %46 = math.exp %45 : vector<4x24x24xf32>
    %cst_25 = arith.constant dense<0.000000e+00> : vector<4x24xf32>
    %47 = vector.multi_reduction <add>, %46, %cst_25 [2] : vector<4x24x24xf32> to vector<4x24xf32>
    %48 = vector.shape_cast %47 : vector<4x24xf32> to vector<4x24x1xf32>
    %49 = tpu.reciprocal %48 {approx = true} : vector<4x24x1xf32> -> vector<4x24x1xf32>
    %50 = vector.broadcast %49 : vector<4x24x1xf32> to vector<4x24x24xf32>
    %51 = arith.mulf %46, %50 : vector<4x24x24xf32>
    %52 = arith.truncf %51 : vector<4x24x24xf32> to vector<4x24x24xbf16>
    %53 = arith.truncf %33 : vector<4x24x8xf32> to vector<4x24x8xbf16>
    %cst_26 = arith.constant dense<0.000000e+00> : vector<4x24x8xf32>
    %54 = tpu.matmul %52, %53, %cst_26 {dimension_numbers = #tpu.dot_dimension_numbers<[2], [1], [1], [2], [0, 0, 0, 1, 1, 2], [0], [0]>} : vector<4x24x24xbf16>, vector<4x24x8xbf16>, vector<4x24x8xf32> -> vector<4x24x8xf32>
    %55 = arith.truncf %54 : vector<4x24x8xf32> to vector<4x24x8xbf16>
    %c0_27 = arith.constant 0 : index
    %c0_28 = arith.constant 0 : index
    %c0_29 = arith.constant 0 : index
    %56 = vector.load %arg7[%c0_27, %c0_28, %c0_29] : memref<4x8x32xbf16, #tpu.memory_space<vmem>>, vector<4x8x32xbf16>
    %cst_30 = arith.constant dense<0.000000e+00> : vector<4x24x32xf32>
    %57 = tpu.matmul %55, %56, %cst_30 {dimension_numbers = #tpu.dot_dimension_numbers<[2], [1], [1], [2], [0, 0, 0, 1, 1, 2], [0], [0]>} : vector<4x24x8xbf16>, vector<4x8x32xbf16>, vector<4x24x32xf32> -> vector<4x24x32xf32>
    %cst_31 = arith.constant dense<0.000000e+00> : vector<24x32xf32>
    %58 = vector.multi_reduction <add>, %57, %cst_31 [0] : vector<4x24x32xf32> to vector<24x32xf32>
    %c0_32 = arith.constant 0 : index
    %c0_33 = arith.constant 0 : index
    %59 = vector.load %arg8[%c0_32, %c0_33] : memref<1x32xf32, #tpu.memory_space<vmem>>, vector<1x32xf32>
    %60 = vector.broadcast %59 : vector<1x32xf32> to vector<24x32xf32>
    %61 = arith.addf %58, %60 : vector<24x32xf32>
    %62 = arith.addf %1, %61 : vector<24x32xf32>
    %c0_34 = arith.constant 0 : index
    %c0_35 = arith.constant 0 : index
    %63 = vector.load %arg9[%c0_34, %c0_35] : memref<1x32xf32, #tpu.memory_space<vmem>>, vector<1x32xf32>
    %c0_36 = arith.constant 0 : index
    %c0_37 = arith.constant 0 : index
    %64 = vector.load %arg10[%c0_36, %c0_37] : memref<1x32xf32, #tpu.memory_space<vmem>>, vector<1x32xf32>
    %cst_38 = arith.constant dense<0.000000e+00> : vector<24xf32>
    %65 = vector.multi_reduction <add>, %62, %cst_38 [1] : vector<24x32xf32> to vector<24xf32>
    %66 = vector.shape_cast %65 : vector<24xf32> to vector<24x1xf32>
    %cst_39 = arith.constant 3.200000e+01 : f32
    %67 = vector.broadcast %cst_39 : f32 to vector<24x1xf32>
    %68 = arith.divf %66, %67 : vector<24x1xf32>
    %69 = vector.broadcast %68 : vector<24x1xf32> to vector<24x32xf32>
    %70 = arith.subf %62, %69 : vector<24x32xf32>
    %71 = arith.mulf %70, %70 : vector<24x32xf32>
    %cst_40 = arith.constant dense<0.000000e+00> : vector<24xf32>
    %72 = vector.multi_reduction <add>, %71, %cst_40 [1] : vector<24x32xf32> to vector<24xf32>
    %73 = vector.shape_cast %72 : vector<24xf32> to vector<24x1xf32>
    %cst_41 = arith.constant 3.200000e+01 : f32
    %74 = vector.broadcast %cst_41 : f32 to vector<24x1xf32>
    %75 = arith.divf %73, %74 : vector<24x1xf32>
    %cst_42 = arith.constant 9.99999974E-6 : f32
    %76 = vector.broadcast %cst_42 : f32 to vector<24x1xf32>
    %77 = arith.addf %75, %76 : vector<24x1xf32>
    %78 = math.rsqrt %77 : vector<24x1xf32>
    %79 = vector.broadcast %78 : vector<24x1xf32> to vector<24x32xf32>
    %80 = arith.mulf %70, %79 : vector<24x32xf32>
    %81 = vector.broadcast %63 : vector<1x32xf32> to vector<24x32xf32>
    %82 = arith.mulf %80, %81 : vector<24x32xf32>
    %83 = vector.broadcast %64 : vector<1x32xf32> to vector<24x32xf32>
    %84 = arith.addf %82, %83 : vector<24x32xf32>
    %85 = arith.truncf %84 : vector<24x32xf32> to vector<24x32xbf16>
    %c0_43 = arith.constant 0 : index
    %c0_44 = arith.constant 0 : index
    %86 = vector.load %arg11[%c0_43, %c0_44] : memref<32x128xbf16, #tpu.memory_space<vmem>>, vector<32x128xbf16>
    %cst_45 = arith.constant dense<0.000000e+00> : vector<24x128xf32>
    %87 = tpu.matmul %85, %86, %cst_45 {dimension_numbers = #tpu.dot_dimension_numbers<[1], [0], [0], [1], [0, 0, 1, 1], [], []>} : vector<24x32xbf16>, vector<32x128xbf16>, vector<24x128xf32> -> vector<24x128xf32>
    %c0_46 = arith.constant 0 : index
    %c0_47 = arith.constant 0 : index
    %88 = vector.load %arg12[%c0_46, %c0_47] : memref<1x128xf32, #tpu.memory_space<vmem>>, vector<1x128xf32>
    %89 = vector.broadcast %88 : vector<1x128xf32> to vector<24x128xf32>
    %90 = arith.addf %87, %89 : vector<24x128xf32>
    %cst_48 = arith.constant 5.000000e-01 : f32
    %91 = vector.broadcast %cst_48 : f32 to vector<24x128xf32>
    %92 = arith.mulf %91, %90 : vector<24x128xf32>
    %cst_49 = arith.constant 0.707106769 : f32
    %93 = vector.broadcast %cst_49 : f32 to vector<24x128xf32>
    %94 = arith.mulf %90, %93 : vector<24x128xf32>
    %95 = math.erf %94 : vector<24x128xf32>
    %cst_50 = arith.constant 1.000000e+00 : f32
    %96 = vector.broadcast %cst_50 : f32 to vector<24x128xf32>
    %97 = arith.addf %96, %95 : vector<24x128xf32>
    %98 = arith.mulf %92, %97 : vector<24x128xf32>
    %99 = arith.truncf %98 : vector<24x128xf32> to vector<24x128xbf16>
    %100 = tpu.concatenate %99, %85 in 1 : vector<24x128xbf16>, vector<24x32xbf16> -> vector<24x160xbf16>
    %c0_51 = arith.constant 0 : index
    %c0_52 = arith.constant 0 : index
    %101 = vector.load %arg13[%c0_51, %c0_52] : memref<160x128xbf16, #tpu.memory_space<vmem>>, vector<160x128xbf16>
    %cst_53 = arith.constant dense<0.000000e+00> : vector<24x128xf32>
    %102 = tpu.matmul %100, %101, %cst_53 {dimension_numbers = #tpu.dot_dimension_numbers<[1], [0], [0], [1], [0, 0, 1, 1], [], []>} : vector<24x160xbf16>, vector<160x128xbf16>, vector<24x128xf32> -> vector<24x128xf32>
    %c0_54 = arith.constant 0 : index
    %c0_55 = arith.constant 0 : index
    %103 = vector.load %arg14[%c0_54, %c0_55] : memref<1x128xf32, #tpu.memory_space<vmem>>, vector<1x128xf32>
    %104 = vector.broadcast %103 : vector<1x128xf32> to vector<24x128xf32>
    %105 = arith.addf %102, %104 : vector<24x128xf32>
    %c0_56 = arith.constant 0 : index
    %c0_57 = arith.constant 0 : index
    %c0_58 = arith.constant 0 : index
    %106 = vector.load %arg15[%c0_56, %c0_57, %c0_58] : memref<1x24x128xf32, #tpu.memory_space<vmem>>, vector<1x24x128xf32>
    %107 = vector.shape_cast %106 : vector<1x24x128xf32> to vector<24x128xf32>
    %108 = vector.shape_cast %105 : vector<24x128xf32> to vector<1x24x128xf32>
    tpu.vector_store %arg15[%c0_56, %c0_57, %c0_58], %108 {strides = array<i32>} : memref<1x24x128xf32, #tpu.memory_space<vmem>>, vector<1x24x128xf32>,
    return
  }
  func.func @transform_0(%arg0: i32) -> (i32, i32, i32) {
    %c0_i32 = arith.constant 0 : i32
    %c0_i32_0 = arith.constant 0 : i32
    %c0_i32_1 = arith.constant 0 : i32
    return %arg0, %c0_i32, %c0_i32_0 : i32, i32, i32
  }
  func.func @transform_1(%arg0: i32) -> (i32, i32) {
    %c0_i32 = arith.constant 0 : i32
    %c0_i32_0 = arith.constant 0 : i32
    %c0_i32_1 = arith.constant 0 : i32
    return %c0_i32, %c0_i32_0 : i32, i32
  }
  func.func @transform_2(%arg0: i32) -> (i32, i32) {
    %c0_i32 = arith.constant 0 : i32
    %c0_i32_0 = arith.constant 0 : i32
    %c0_i32_1 = arith.constant 0 : i32
    return %c0_i32, %c0_i32_0 : i32, i32
  }
  func.func @transform_3(%arg0: i32) -> (i32, i32, i32) {
    %c0_i32 = arith.constant 0 : i32
    %c0_i32_0 = arith.constant 0 : i32
    %c0_i32_1 = arith.constant 0 : i32
    %c0_i32_2 = arith.constant 0 : i32
    return %c0_i32, %c0_i32_0, %c0_i32_1 : i32, i32, i32
  }
  func.func @transform_4(%arg0: i32) -> (i32, i32, i32) {
    %c0_i32 = arith.constant 0 : i32
    %c0_i32_0 = arith.constant 0 : i32
    %c0_i32_1 = arith.constant 0 : i32
    %c0_i32_2 = arith.constant 0 : i32
    return %c0_i32, %c0_i32_0, %c0_i32_1 : i32, i32, i32
  }
  func.func @transform_5(%arg0: i32) -> (i32, i32, i32) {
    %c0_i32 = arith.constant 0 : i32
    %c0_i32_0 = arith.constant 0 : i32
    %c0_i32_1 = arith.constant 0 : i32
    %c0_i32_2 = arith.constant 0 : i32
    return %c0_i32, %c0_i32_0, %c0_i32_1 : i32, i32, i32
  }
  func.func @transform_6(%arg0: i32) -> (i32, i32, i32) {
    %c0_i32 = arith.constant 0 : i32
    %c0_i32_0 = arith.constant 0 : i32
    %c0_i32_1 = arith.constant 0 : i32
    %c0_i32_2 = arith.constant 0 : i32
    return %c0_i32, %c0_i32_0, %c0_i32_1 : i32, i32, i32
  }
  func.func @transform_7(%arg0: i32) -> (i32, i32) {
    %c0_i32 = arith.constant 0 : i32
    %c0_i32_0 = arith.constant 0 : i32
    %c0_i32_1 = arith.constant 0 : i32
    return %c0_i32, %c0_i32_0 : i32, i32
  }
  func.func @transform_8(%arg0: i32) -> (i32, i32) {
    %c0_i32 = arith.constant 0 : i32
    %c0_i32_0 = arith.constant 0 : i32
    %c0_i32_1 = arith.constant 0 : i32
    return %c0_i32, %c0_i32_0 : i32, i32
  }
  func.func @transform_9(%arg0: i32) -> (i32, i32) {
    %c0_i32 = arith.constant 0 : i32
    %c0_i32_0 = arith.constant 0 : i32
    %c0_i32_1 = arith.constant 0 : i32
    return %c0_i32, %c0_i32_0 : i32, i32
  }
  func.func @transform_10(%arg0: i32) -> (i32, i32) {
    %c0_i32 = arith.constant 0 : i32
    %c0_i32_0 = arith.constant 0 : i32
    %c0_i32_1 = arith.constant 0 : i32
    return %c0_i32, %c0_i32_0 : i32, i32
  }
  func.func @transform_11(%arg0: i32) -> (i32, i32) {
    %c0_i32 = arith.constant 0 : i32
    %c0_i32_0 = arith.constant 0 : i32
    %c0_i32_1 = arith.constant 0 : i32
    return %c0_i32, %c0_i32_0 : i32, i32
  }
  func.func @transform_12(%arg0: i32) -> (i32, i32) {
    %c0_i32 = arith.constant 0 : i32
    %c0_i32_0 = arith.constant 0 : i32
    %c0_i32_1 = arith.constant 0 : i32
    return %c0_i32, %c0_i32_0 : i32, i32
  }
  func.func @transform_13(%arg0: i32) -> (i32, i32) {
    %c0_i32 = arith.constant 0 : i32
    %c0_i32_0 = arith.constant 0 : i32
    %c0_i32_1 = arith.constant 0 : i32
    return %c0_i32, %c0_i32_0 : i32, i32
  }
  func.func @transform_14(%arg0: i32) -> (i32, i32, i32) {
    %c0_i32 = arith.constant 0 : i32
    %c0_i32_0 = arith.constant 0 : i32
    %c0_i32_1 = arith.constant 0 : i32
    return %arg0, %c0_i32, %c0_i32_0 : i32, i32, i32
  }
}

</mosaic_0001>

<bundles_post_ra>
// kernel: tpu_custom_call.1
= control target key start
LH: loop header
LB: loop body
LE: loop exit
PB: predicated region body
PF: predicated region fallthrough
CT: control target
= control target key end

     0   :  { %s3835_s0 = inlined_call_operand.vmem [shape: f32[2,24,32], index: 0, kind: input, shape index: {}]   ;;  %s3836_s1 = inlined_call_operand.vmem [shape: f32[1,32], index: 1, kind: input, shape index: {}]   ;;  %s3837_s2 = inlined_call_operand.vmem [shape: f32[1,32], index: 2, kind: input, shape index: {}]   ;;  %s3838_s3 = inlined_call_operand.vmem [shape: bf16[4,32,8], index: 3, kind: input, shape index: {}]   ;;  %s3839_s4 = inlined_call_operand.vmem [shape: bf16[4,32,8], index: 4, kind: input, shape index: {}]   ;;  %s3840_s5 = inlined_call_operand.vmem [shape: bf16[4,32,8], index: 5, kind: input, shape index: {}]   ;;  %s3841_s6 = inlined_call_operand.vmem [shape: bf16[4,8,32], index: 6, kind: input, shape index: {}]   ;;  %s3842_s7 = inlined_call_operand.vmem [shape: f32[1,32], index: 7, kind: input, shape index: {}]   ;;  %s3843_s8 = inlined_call_operand.vmem [shape: f32[1,32], index: 8, kind: input, shape index: {}]   ;;  %s3844_s9 = inlined_call_operand.vmem [shape: f32[1,32], index: 9, kind: input, shape index: {}]   ;;  %s3845_s10 = inlined_call_operand.vmem [shape: bf16[32,128], index: 10, kind: input, shape index: {}]   ;;  %s3846_s11 = inlined_call_operand.vmem [shape: f32[1,128], index: 11, kind: input, shape index: {}]   ;;  %s3847_s12 = inlined_call_operand.vmem [shape: bf16[160,128], index: 12, kind: input, shape index: {}]   ;;  %s3848_s13 = inlined_call_operand.vmem [shape: f32[1,128], index: 13, kind: input, shape index: {}]   ;;  %s3849_s14 = inlined_call_operand.hbm [shape: f32[2,24,128], index: 14, kind: output, shape index: {}]  }
   0x1   :  { %3850 = sst [smem:[#allocation6_spill]] %s3835_s0 }
   0x2   :  { %3851 = sst [smem:[#allocation7_spill]] %s3836_s1 }
   0x3   :  { %3852 = sst [smem:[#allocation8_spill]] %s3837_s2 }
   0x4   :  { %19 = vsyncpa [#allocation3], 0 }
   0x5   :  { %21 = vsyncpa [#allocation3 + $0x1], 0  ;;  %s3300_s29 = smov 0   ;;  %s3302_s30 = smov 0  }
   0x6   :  { %s3304_s15 = smov 0   ;;  %s3306_s16 = smov 0  }
   0x7 LB: > { %s3321_s17 = sadd.s32 4294967295, %s3219_s16   ;;  %s2600_s18 = sadd.s32 4294967294, %s3219_s16   ;;  %s3219_s16 = sphi %s3306_s16, %s3863_s16   ;;  %s3215_s15 = sphi %s3304_s15, %s3862_s15   ;;  %s3211_s30 = sphi %s3302_s30, %s3861_s30   ;;  %s3207_s29 = sphi %s3300_s29, %s3860_s29  }
   0x8   : > { %s3325_s19 = sadd.s32 1, %s3219_s16   ;;  %s333_s20 = sadd.s32 1, %s3215_s15 }
   0x9   : > { %s330_s21 = ssub.s32 %s3219_s16, %s3325_s19  ;;  %p343_p0 = scmp.ne.s32.totalorder %s3215_s15, %s3211_s30 }
   0xa   : > { %p331_p1 = scmp.eq.s32.totalorder %s330_s21, 0  ;;  %p344_p2 = scmp.eq.s32.totalorder %s3321_s17, 1 }
   0xb   : > { %p349_p3 = scmp.ne.s32.totalorder %s3211_s30, %s3207_s29  ;;  %p350_p4 = scmp.eq.s32.totalorder %s2600_s18, 1 }
   0xc   : > { %s3336_s22 = scalar_select %p331_p1, %s3215_s15, %s333_s20  }
   0xd   : > { %p3338_p5 = por %p344_p2, %p343_p0  ;;  %p3342_p6 = por %p350_p4, %p349_p3 }
   0xe   : > { %3853 = sst [smem:[#allocation5_spill]] %s3336_s22  ;;  %p2603_p7 = scmp.ge.s32.totalorder %s3219_s16, 1 }
   0xf   : > { %p415_p8 = scmp.lt.s32.totalorder %s3219_s16, 3 }
  0x11   : > { %p416_p9 = pnand %p2603_p7, %p415_p8 }
  0x12   : > { %p461_p10 = scmp.lt.s32.totalorder (!%p416_p9), %s3321_s17, 1  ;;  %vm472_vm0 = vcmask (!%p416_p9), 261120   ;;  %s3856_s0 = sld [smem:[#allocation6_spill]] (!%p416_p9)  ;;  %v3052_v21 = vld [vmem:[%s3838_s3] sm:$0xff] (!%p416_p9)   ;;  %v3053_v22 = vld [vmem:[%s3838_s3 + $0x10] sm:$0xff] (!%p416_p9)   ;;  %v3054_v23 = vld [vmem:[%s3838_s3 + $0x8] sm:$0xff] (!%p416_p9)  }
  0x13   : > { %419 = sbr.rel (%p416_p9) target bundleno = 2402 (0x962), region = 76  ;;  %2799 = vmatprep.subr.bf16.mxu0 (!%p416_p9), %v3052_v21  ;;  %2807 = vmatprep.subr.bf16.mxu1 (!%p416_p9), %v3053_v22  ;;  %v3055_v24 = vld [vmem:[%s3838_s3 + $0x18] sm:$0xff] (!%p416_p9)   ;;  %v3056_v25 = vld [vmem:[%s3838_s3 + $0x20] sm:$0xff] (!%p416_p9)   ;;  %v3057_v26 = vld [vmem:[%s3838_s3 + $0x30] sm:$0xff] (!%p416_p9)   ;;  %s3857_s1 = sld [smem:[#allocation7_spill]] (!%p416_p9)  ;;  %vm1323_vm1 = vcmask (!%p416_p9), 64512  }
  0x14   : > { %2800 = vmatpush3.bf16.msra.mxu0 (!%p416_p9), %v3052_v21  ;;  %2808 = vmatpush3.bf16.msra.mxu1 (!%p416_p9), %v3053_v22  ;;  %s3858_s2 = sld [smem:[#allocation8_spill]] (!%p416_p9)  ;;  %v3058_v52 = vld [vmem:[%s3838_s3 + $0x28] sm:$0xff] (!%p416_p9)   ;;  %v3059_v53 = vld [vmem:[%s3838_s3 + $0x38] sm:$0xff] (!%p416_p9)   ;;  %v3060_v54 = vld [vmem:[%s3839_s4] sm:$0xff] (!%p416_p9)   ;;  %vm1734_vm2 = vcmask (!%p416_p9), 1043456   ;;  %vm1579_vm4 = vcmask (!%p416_p9), 195584  }
  0x15   : > { %2801 = vmatprep.subr.bf16.mxu0 (!%p416_p9), %v3054_v23  ;;  %2809 = vmatprep.subr.bf16.mxu1 (!%p416_p9), %v3055_v24  ;;  %v3061_v55 = vld [vmem:[%s3839_s4 + $0x10] sm:$0xff] (!%p416_p9)   ;;  %v3062_v56 = vld [vmem:[%s3839_s4 + $0x8] sm:$0xff] (!%p416_p9)   ;;  %v3063_v57 = vld [vmem:[%s3839_s4 + $0x18] sm:$0xff] (!%p416_p9)   ;;  %s458_s20 = sand.u32 (!%p416_p9), 1, %s3211_s30  }
  0x16   : > { %v3064_v58 = vld [vmem:[%s3839_s4 + $0x20] sm:$0xff] (!%p416_p9)   ;;  %v3065_v59 = vld [vmem:[%s3839_s4 + $0x30] sm:$0xff] (!%p416_p9)   ;;  %v3066_v60 = vld [vmem:[%s3839_s4 + $0x28] sm:$0xff] (!%p416_p9)   ;;  %s3007_s21 = smul.u32 (!%p416_p9), 24, %s458_s20 }
  0x17   : > { %v3067_v61 = vld [vmem:[%s3839_s4 + $0x38] sm:$0xff] (!%p416_p9)   ;;  %v3068_v62 = vld [vmem:[%s3840_s5] sm:$0xff] (!%p416_p9)   ;;  %v3069_v63 = vld [vmem:[%s3840_s5 + $0x10] sm:$0xff] (!%p416_p9)  }
  0x18   : > { %2802 = vmatpush3.bf16.msra.mxu0 (!%p416_p9), %v3054_v23  ;;  %2810 = vmatpush3.bf16.msra.mxu1 (!%p416_p9), %v3055_v24 }
  0x19   : > { %2815 = vmatprep.subr.bf16.mxu0 (!%p416_p9), %v3056_v25  ;;  %2823 = vmatprep.subr.bf16.mxu1 (!%p416_p9), %v3057_v26  ;;  %v2605_v38 = vld [vmem:[%s3857_s1] ss:$0 sm:$0xff] (!%p416_p9) }
  0x1a   : > { %s462_s25 = scalar_select %p461_p10, %s3321_s17, 1  ;;  %v2606_v44 = vld [vmem:[%s3858_s2] ss:$0 sm:$0xff] }
  0x1c   : > { %s3008_s26 = smul.u32 24, %s462_s25 }
  0x1e   : > { %s3353_s18 = scalar_lea.vmem %s3856_s0, %s3008_s26  ;;  %s460_s0 = scalar_lea.vmem [#allocation2], %s3007_s21 }
  0x1f   : > { %v467_v0 = vld [vmem:[%s3353_s18] sm:$0xff]  ;;  %v469_v1 = vld [vmem:[%s3353_s18 + $0x10] sm:$0xff]  ;;  %v468_v2 = vld [vmem:[%s3353_s18 + $0x8] sm:$0xff]  ;;  %s2538_s22 = sshll.u32 %s460_s0, 4  ;;  %s3794_s21 = scalar_lea.sflag [#allocation3], %s458_s20  ;;  %s3787_s22 = int_to_ptr.vmem [resolvable:$true] %s2538_s22 }
  0x20   : > { %v473_v3 = vsel %vm472_vm0, %v467_v0, 0.0  ;;  %v479_v4 = vsel %vm472_vm0, %v469_v1, 0.0  ;;  %v476_v5 = vsel %vm472_vm0, %v468_v2, 0.0  ;;  %s3157_s26 = scalar_lea.vmem %s3787_s22, 384 }
  0x21   : > { %474 = vadd.xlane.f32.xlu0 %v473_v3  ;;  %480 = vadd.xlane.f32.xlu1 %v479_v4  ;;  %v3073_v3 = vld [vmem:[%s3840_s5 + $0x30] sm:$0xff]   ;;  %v3074_v4 = vld [vmem:[%s3840_s5 + $0x28] sm:$0xff]   ;;  %p3158_p11 = scmp.ne.s32.totalorder %s3787_s22, %s3157_s26 }
  0x23   : > { %p3159_p12 = pnand %p3158_p11, %p3338_p5 }
  0x25   : > { %477 = vadd.xlane.f32.xlu0 %v476_v5  ;;  %v3075_v5 = vld [vmem:[%s3840_s5 + $0x38] sm:$0xff]   ;;  %p3160_p13 = pneg %p3159_p12 }
  0xae   : > { %v475_v6 = vpop.xlane.xlu0 %474  ;;  %v481_v7 = vpop.xlane.xlu1 %480 }
  0xaf   : > { %v483_v8 = vmul.f32 0.03125, %v475_v6  ;;  %v485_v9 = vmul.f32 0.03125, %v481_v7 }
  0xb1   : > { %v486_v10 = vsub.f32 %v467_v0, %v483_v8  ;;  %v488_v11 = vsub.f32 %v469_v1, %v485_v9  ;;  %v3070_v0 = vld [vmem:[%s3840_s5 + $0x8] sm:$0xff]   ;;  %v3071_v1 = vld [vmem:[%s3840_s5 + $0x18] sm:$0xff]  }
  0xb2   : > { %v478_v12 = vpop.xlane.xlu0 %477 }
  0xb3   : > { %v484_v13 = vmul.f32 0.03125, %v478_v12  ;;  %v489_v14 = vmul.f32 %v486_v10, %v486_v10  ;;  %v491_v15 = vmul.f32 %v488_v11, %v488_v11 }
  0xb5   : > { %v487_v16 = vsub.f32 %v468_v2, %v484_v13  ;;  %v492_v17 = vsel %vm472_vm0, %v489_v14, 0.0  ;;  %v498_v18 = vsel %vm472_vm0, %v491_v15, 0.0  ;;  %v3072_v2 = vld [vmem:[%s3840_s5 + $0x20] sm:$0xff]  }
  0xb6   : > { %493 = vadd.xlane.f32.xlu1 %v492_v17 }
  0xb7   : > { %v490_v19 = vmul.f32 %v487_v16, %v487_v16 }
  0xb9   : > { %v495_v20 = vsel %vm472_vm0, %v490_v19, 0.0 }
  0xba   : > { %499 = vadd.xlane.f32.xlu1 %v498_v18  ;;  %496 = vadd.xlane.f32.xlu0 %v495_v20 }
 0x143   : > { %v494_v27 = vpop.xlane.xlu1 %493 }
 0x144   : > { %v501_v28 = vmul.f32 0.03125, %v494_v27 }
 0x146   : > { %v504_v29 = vadd.f32 1e-05, %v501_v28 }
 0x147   : > { %v500_v30 = vpop.xlane.xlu1 %499  ;;  %v497_v31 = vpop.xlane.xlu0 %496 }
 0x148   : > { %3088 = vrsqrt.f32 %v504_v29  ;;  %v503_v32 = vmul.f32 0.03125, %v500_v30  ;;  %v502_v33 = vmul.f32 0.03125, %v497_v31 }
 0x14a   : > { %v506_v34 = vadd.f32 1e-05, %v503_v32  ;;  %v505_v35 = vadd.f32 1e-05, %v502_v33 }
 0x14c   : > { %3090 = vrsqrt.f32 %v506_v34 }
 0x14d   : > { %3092 = vrsqrt.f32 %v505_v35 }
 0x152   : > { %v3089_v36 = vpop.eup %3088 }
 0x153   : > { %v510_v37 = vmul.f32 %v3089_v36, %v486_v10 }
 0x155   : > { %v519_v42 = vmul.f32 %v2605_v38, %v510_v37 }
 0x156   : > { %v3091_v39 = vpop.eup %3090 }
 0x157   : > { %v3093_v40 = vpop.eup %3092  ;;  %v512_v41 = vmul.f32 %v3091_v39, %v488_v11  ;;  %v528_v48 = vadd.f32 %v2606_v44, %v519_v42 }
 0x158   : > { %v511_v43 = vmul.f32 %v3093_v40, %v487_v16 }
 0x159   : > { %v521_v45 = vmul.f32 %v2605_v38, %v512_v41 }
 0x15a   : > { %v520_v46 = vmul.f32 %v2605_v38, %v511_v43 }
 0x15b   : > { %v530_v47 = vadd.f32 %v2606_v44, %v521_v45 }
 0x15c   : > { %v529_v49 = vadd.f32 %v2606_v44, %v520_v46 }
 0x15d   : > { %v3388_v50 = vpack.c.bf16 %v530_v47, %v530_v47 }
 0x15e   : > { %v3390_v51 = vpack.c.bf16 %v529_v49, %v528_v48 }
 0x160   : > { %2803 = vmatprep.mubr.msk.bf16.mxu0 %vm472_vm0, %v3390_v51  ;;  %2811 = vmatprep.mubr.msk.bf16.mxu1 %vm472_vm0, %v3390_v51 }
 0x161   : > { %2804 = vmatmul.mubr.msk.bf16.vlgmr.msra.gmra.mrb[0].mxu0 %vm472_vm0, %v3388_v50  ;;  %2812 = vmatmul.mubr.msk.bf16.vlgmr.msra.gmra.mrb[0].mxu1 %vm472_vm0, %v3388_v50 }
 0x162   : > { %2816 = vmatpush3.bf16.msra.mxu0 %v3056_v25  ;;  %2819 = vmatprep.mubr.msk.bf16.mxu0 %vm472_vm0, %v3390_v51 }
 0x163   : > { %2824 = vmatpush3.bf16.msra.mxu1 %v3057_v26  ;;  %2827 = vmatprep.mubr.msk.bf16.mxu1 %vm472_vm0, %v3390_v51 }
 0x164   : > { %2817 = vmatprep.subr.bf16.mxu0 %v3058_v52  ;;  %2825 = vmatprep.subr.bf16.mxu1 %v3059_v53 }
 0x166   : > { %2818 = vmatpush3.bf16.msra.mxu0 %v3058_v52 }
 0x167   : > { %2826 = vmatpush3.bf16.msra.mxu1 %v3059_v53  ;;  %2831 = vmatprep.subr.bf16.mxu0 %v3060_v54 }
 0x168   : > { %2839 = vmatprep.subr.bf16.mxu1 %v3061_v55 }
 0x169   : > { %2820 = vmatmul.mubr.msk.bf16.vlgmr.msra.gmra.mrb[4].mxu0 %vm472_vm0, %v3388_v50 }
 0x16a   : > { %2828 = vmatmul.mubr.msk.bf16.vlgmr.msra.gmra.mrb[4].mxu1 %vm472_vm0, %v3388_v50  ;;  %2832 = vmatpush3.bf16.msra.mxu0 %v3060_v54 }
 0x16b   : > { %2835 = vmatprep.mubr.msk.bf16.mxu0 %vm472_vm0, %v3390_v51  ;;  %2840 = vmatpush3.bf16.msra.mxu1 %v3061_v55 }
 0x16c   : > { %2843 = vmatprep.mubr.msk.bf16.mxu1 %vm472_vm0, %v3390_v51  ;;  %2833 = vmatprep.subr.bf16.mxu0 %v3062_v56 }
 0x16d   : > { %2841 = vmatprep.subr.bf16.mxu1 %v3063_v57 }
 0x16e   : > { %2834 = vmatpush3.bf16.msra.mxu0 %v3062_v56 }
 0x16f   : > { %2842 = vmatpush3.bf16.msra.mxu1 %v3063_v57  ;;  %2847 = vmatprep.subr.bf16.mxu0 %v3064_v58 }
 0x170   : > { %2855 = vmatprep.subr.bf16.mxu1 %v3065_v59 }
 0x171   : > { %2836 = vmatmul.mubr.msk.bf16.vlgmr.msra.gmra.mrb[8].mxu0 %vm472_vm0, %v3388_v50 }
 0x172   : > { %2844 = vmatmul.mubr.msk.bf16.vlgmr.msra.gmra.mrb[8].mxu1 %vm472_vm0, %v3388_v50  ;;  %2848 = vmatpush3.bf16.msra.mxu0 %v3064_v58 }
 0x173   : > { %2851 = vmatprep.mubr.msk.bf16.mxu0 %vm472_vm0, %v3390_v51  ;;  %2856 = vmatpush3.bf16.msra.mxu1 %v3065_v59 }
 0x174   : > { %2859 = vmatprep.mubr.msk.bf16.mxu1 %vm472_vm0, %v3390_v51  ;;  %2849 = vmatprep.subr.bf16.mxu0 %v3066_v60 }
 0x175   : > { %2857 = vmatprep.subr.bf16.mxu1 %v3067_v61 }
 0x176   : > { %2850 = vmatpush3.bf16.msra.mxu0 %v3066_v60 }
 0x177   : > { %2858 = vmatpush3.bf16.msra.mxu1 %v3067_v61  ;;  %2863 = vmatprep.subr.bf16.mxu0 %v3068_v62 }
 0x178   : > { %2871 = vmatprep.subr.bf16.mxu1 %v3069_v63 }
 0x179   : > { %2852 = vmatmul.mubr.msk.bf16.vlgmr.msra.gmra.mrb[12].mxu0 %vm472_vm0, %v3388_v50 }
 0x17a   : > { %2860 = vmatmul.mubr.msk.bf16.vlgmr.msra.gmra.mrb[12].mxu1 %vm472_vm0, %v3388_v50  ;;  %2864 = vmatpush3.bf16.msra.mxu0 %v3068_v62 }
 0x17b   : > { %2867 = vmatprep.mubr.msk.bf16.mxu0 %vm472_vm0, %v3390_v51  ;;  %2872 = vmatpush3.bf16.msra.mxu1 %v3069_v63 }
 0x17c   : > { %2875 = vmatprep.mubr.msk.bf16.mxu1 %vm472_vm0, %v3390_v51  ;;  %2865 = vmatprep.subr.bf16.mxu0 %v3070_v0 }
 0x17d   : > { %2873 = vmatprep.subr.bf16.mxu1 %v3071_v1 }
 0x17e   : > { %2866 = vmatpush3.bf16.msra.mxu0 %v3070_v0 }
 0x17f   : > { %2874 = vmatpush3.bf16.msra.mxu1 %v3071_v1  ;;  %2879 = vmatprep.subr.bf16.mxu0 %v3072_v2 }
 0x180   : > { %2887 = vmatprep.subr.bf16.mxu1 %v3073_v3 }
 0x181   : > { %2868 = vmatmul.mubr.msk.bf16.vlgmr.msra.gmra.mrb[16].mxu0 %vm472_vm0, %v3388_v50 }
 0x182   : > { %2876 = vmatmul.mubr.msk.bf16.vlgmr.msra.gmra.mrb[16].mxu1 %vm472_vm0, %v3388_v50  ;;  %2880 = vmatpush3.bf16.msra.mxu0 %v3072_v2 }
 0x183   : > { %2883 = vmatprep.mubr.msk.bf16.mxu0 %vm472_vm0, %v3390_v51  ;;  %2888 = vmatpush3.bf16.msra.mxu1 %v3073_v3 }
 0x184   : > { %2891 = vmatprep.mubr.msk.bf16.mxu1 %vm472_vm0, %v3390_v51  ;;  %2881 = vmatprep.subr.bf16.mxu0 %v3074_v4 }
 0x185   : > { %2889 = vmatprep.subr.bf16.mxu1 %v3075_v5 }
 0x186   : > { %2882 = vmatpush3.bf16.msra.mxu0 %v3074_v4 }
 0x187   : > { %2890 = vmatpush3.bf16.msra.mxu1 %v3075_v5 }
 0x189   : > { %2884 = vmatmul.mubr.msk.bf16.vlgmr.msra.gmra.mrb[20].mxu0 %vm472_vm0, %v3388_v50 }
 0x18a   : > { %2892 = vmatmul.mubr.msk.bf16.vlgmr.msra.gmra.mrb[20].mxu1 %vm472_vm0, %v3388_v50 }
 0x234   : > { %v3494_v6 = vpop.f32.mrb[0].mxu0  ;;  %v3496_v7 = vpop.f32.mrb[0].mxu1 }
 0x235   : > { %v601_v8 = vpop.f32.mrb[1].mxu0  ;;  %v3498_v9 = vpop.f32.mrb[1].mxu1  ;;  %v1308_v58 = vpack.c.bf16 %v3494_v6, %v3494_v6 }
 0x236   : > { %v2806_v10 = vpop.f32.mrb[2].mxu0  ;;  %v2814_v11 = vpop.f32.mrb[2].mxu1 }
 0x237   : > { %v604_v12 = vpop.f32.mrb[3].mxu0  ;;  %v3500_v13 = vpop.f32.mrb[3].mxu1 }
 0x238   : > { %v1307_v14 = vpack.c.bf16 %v604_v12, %v601_v8  ;;  %v1309_v15 = vpack.c.bf16 %v3500_v13, %v3498_v9 }
 0x23a   : > { %2899 = vmatprep.mubr.msk.bf16.mxu0 %vm1323_vm1, %v1307_v14 }
 0x23c   : > { %v3505_v16 = vpop.f32.mrb[4].mxu0 }
 0x23d   : > { %v3507_v17 = vpop.f32.mrb[4].mxu1  ;;  %v3509_v18 = vpop.f32.mrb[5].mxu0 }
 0x23e   : > { %v781_v19 = vpop.f32.mrb[5].mxu1  ;;  %v2822_v20 = vpop.f32.mrb[6].mxu0  ;;  %v1314_v11 = vpack.c.bf16 %v3507_v17, %v3507_v17 }
 0x23f   : > { %v2830_v21 = vpop.f32.mrb[6].mxu1  ;;  %v3511_v22 = vpop.f32.mrb[7].mxu0 }
 0x240   : > { %v1311_v23 = vpack.c.bf16 %v3511_v22, %v3509_v18  ;;  %v784_v24 = vpop.f32.mrb[7].mxu1  ;;  %v1564_v18 = vlaneseq }
 0x241   : > { %v1313_v25 = vpack.c.bf16 %v784_v24, %v781_v19  ;;  %v1310_v19 = vpack.c.bf16 %v3496_v7, %v3496_v7  ;;  %v1312_v7 = vpack.c.bf16 %v3505_v16, %v3505_v16 }
 0x242   : > { %v1565_v22 = vand.u32 127, %v1564_v18 }
 0x243   : > { %2923 = vmatprep.mubr.msk.bf16.mxu1 %vm1323_vm1, %v1313_v25 }
 0x244   : > { %v2837_v26 = vpop.f32.mrb[8].mxu0  ;;  %vm1566_vm3 = vcmp.lt.s32.totalorder %v1565_v22, 17 }
 0x245   : > { %v2845_v27 = vpop.f32.mrb[8].mxu1  ;;  %v857_v28 = vpop.f32.mrb[9].mxu0  ;;  %v1316_v36 = vpack.c.bf16 %v2837_v26, %v2837_v26 }
 0x246   : > { %v917_v29 = vpop.f32.mrb[9].mxu1  ;;  %v2838_v30 = vpop.f32.mrb[10].mxu0  ;;  %v1318_v62 = vpack.c.bf16 %v2845_v27, %v2845_v27 }
 0x247   : > { %v2846_v31 = vpop.f32.mrb[10].mxu1  ;;  %v860_v32 = vpop.f32.mrb[11].mxu0  ;;  %v1334_v48 = vsel %vm1323_vm1, %v1316_v36, 0 }
 0x248   : > { %v1315_v33 = vpack.c.bf16 %v860_v32, %v857_v28  ;;  %v920_v34 = vpop.f32.mrb[11].mxu1  ;;  %v1394_v13 = vsel %vm1323_vm1, %v1318_v62, 0 }
 0x249   : > { %v1317_v35 = vpack.c.bf16 %v920_v34, %v917_v29 }
 0x24a   : > { %v1331_v37 = vsel %vm1323_vm1, %v1315_v33, 0  ;;  %2991 = vmatprep.subr.msk.bf16.mxu0 %vm1323_vm1, %v1315_v33 }
 0x24b   : > { %2896 = vmatpush3.bf16.xpose.msra.mxu0 %v1331_v37  ;;  %v1391_v63 = vsel %vm1323_vm1, %v1317_v35, 0 }
 0x24c   : > { %v2853_v38 = vpop.f32.mrb[12].mxu0  ;;  %2992 = vmatprep.subr.msk.bf16.mxu0 %vm1323_vm1, %v1316_v36 }
 0x24d   : > { %v2861_v39 = vpop.f32.mrb[12].mxu1  ;;  %v977_v40 = vpop.f32.mrb[13].mxu0  ;;  %v1320_v17 = vpack.c.bf16 %v2853_v38, %v2853_v38 }
 0x24e   : > { %v1037_v41 = vpop.f32.mrb[13].mxu1  ;;  %v2854_v42 = vpop.f32.mrb[14].mxu0  ;;  %v1322_v49 = vpack.c.bf16 %v2861_v39, %v2861_v39 }
 0x24f   : > { %v2862_v43 = vpop.f32.mrb[14].mxu1  ;;  %v980_v44 = vpop.f32.mrb[15].mxu0  ;;  %v1454_v21 = vsel %vm1323_vm1, %v1320_v17, 0 }
 0x250   : > { %v1319_v45 = vpack.c.bf16 %v980_v44, %v977_v40  ;;  %v1040_v46 = vpop.f32.mrb[15].mxu1  ;;  %v1514_v0 = vsel %vm1323_vm1, %v1322_v49, 0 }
 0x251   : > { %v1321_v47 = vpack.c.bf16 %v1040_v46, %v1037_v41 }
 0x252   : > { %v1451_v20 = vsel %vm1323_vm1, %v1319_v45, 0 }
 0x253   : > { %v1511_v50 = vsel %vm1323_vm1, %v1321_v47, 0  ;;  %2997 = vmatprep.subr.msk.bf16.mxu1 %vm1323_vm1, %v1321_v47  ;;  %2898 = vmatpush3.bf16.xpose.msra.mxu0 %v1334_v48 }
 0x254   : > { %2920 = vmatpush3.bf16.xpose.msra.mxu1 %v1511_v50  ;;  %v2869_v51 = vpop.f32.mrb[16].mxu0  ;;  %2993 = vmatprep.subr.msk.bf16.mxu0 %vm1323_vm1, %v1317_v35 }
 0x255   : > { %v2877_v52 = vpop.f32.mrb[16].mxu1  ;;  %2998 = vmatprep.subr.msk.bf16.mxu1 %vm1323_vm1, %v1322_v49  ;;  %v1113_v53 = vpop.f32.mrb[17].mxu0  ;;  %v1721_v24 = vpack.c.bf16 %v2869_v51, %v2869_v51 }
 0x256   : > { %v1173_v54 = vpop.f32.mrb[17].mxu1  ;;  %v2870_v55 = vpop.f32.mrb[18].mxu0  ;;  %v1723_v14 = vpack.c.bf16 %v2877_v52, %v2877_v52 }
 0x257   : > { %v2878_v56 = vpop.f32.mrb[18].mxu1  ;;  %v1116_v57 = vpop.f32.mrb[19].mxu0  ;;  %v1736_v25 = vsel %vm1734_vm2, %v1721_v24, 0 }
 0x258   : > { %v1720_v59 = vpack.c.bf16 %v1116_v57, %v1113_v53  ;;  %v1176_v60 = vpop.f32.mrb[19].mxu1 }
 0x259   : > { %v1722_v61 = vpack.c.bf16 %v1176_v60, %v1173_v54 }
 0x25a   : > { %2900 = vmatmul.mubr.msk.bf16.vlgmr.msra.gmra.mrb[24].mxu0 %vm1323_vm1, %v1308_v58 }
 0x25b   : > { %2904 = vmatpush3.bf16.xpose.msra.mxu0 %v1391_v63  ;;  %2907 = vmatprep.mubr.msk.bf16.mxu0 %vm1323_vm1, %v1309_v15  ;;  %v1793_v15 = vsel %vm1734_vm2, %v1723_v14, 0 }
 0x25c   : > { %2922 = vmatpush3.bf16.xpose.msra.mxu1 %v1514_v0  ;;  %v3530_v1 = vpop.f32.mrb[20].mxu0  ;;  %2994 = vmatprep.subr.msk.bf16.mxu0 %vm1323_vm1, %v1318_v62 }
 0x25d   : > { %v3533_v2 = vpop.f32.mrb[20].mxu1  ;;  %2935 = vmatprep.subr.bf16.mxu1 %v1722_v61  ;;  %v1233_v3 = vpop.f32.mrb[21].mxu0 }
 0x25e   : > { %v1293_v4 = vpop.f32.mrb[21].mxu1  ;;  %v2886_v5 = vpop.f32.mrb[22].mxu0 }
 0x25f   : > { %v2894_v6 = vpop.f32.mrb[22].mxu1  ;;  %v1236_v8 = vpop.f32.mrb[23].mxu0 }
 0x260   : > { %v3535_v9 = vpack.c.bf16 %v1236_v8, %v1233_v3  ;;  %v1296_v10 = vpop.f32.mrb[23].mxu1 }
 0x261   : > { %v3539_v12 = vpack.c.bf16 %v1296_v10, %v1293_v4 }
 0x263   : > { %2924 = vmatmul.mubr.msk.bf16.vlgmr.msra.gmra.mrb[24].mxu1 %vm1323_vm1, %v1314_v11  ;;  %2906 = vmatpush3.bf16.xpose.msra.mxu0 %v1394_v13 }
 0x264   : > { %2936 = vmatpush3.bf16.msra.mxu1 %v1722_v61  ;;  %2995 = vmatprep.subr.msk.bf16.mxu0 %vm1323_vm1, %v1319_v45 }
 0x265   : > { %3000 = vmatprep.subr.msk.bf16.mxu1 %vm1734_vm2, %v1723_v14 }
 0x268   : > { %2938 = vmatpush3.bf16.msra.mxu1 %v1793_v15 }
 0x269   : > { %2951 = vmatprep.subr.bf16.mxu1 %v3539_v12 }
 0x26a   : > { %2908 = vmatmul.mubr.msk.bf16.vlgmr.msra.gmra.mrb[28].mxu0 %vm1323_vm1, %v1310_v19 }
 0x26b   : > { %2912 = vmatpush3.bf16.xpose.msra.mxu0 %v1451_v20  ;;  %2915 = vmatprep.mubr.msk.bf16.mxu0 %vm1323_vm1, %v1311_v23 }
 0x26c   : > { %2996 = vmatprep.subr.msk.bf16.mxu0 %vm1323_vm1, %v1320_v17 }
 0x273   : > { %2914 = vmatpush3.bf16.xpose.msra.mxu0 %v1454_v21 }
 0x274   : > { %2927 = vmatprep.subr.bf16.mxu0 %v1720_v59 }
 0x27a   : > { %2916 = vmatmul.mubr.msk.bf16.vlgmr.msra.gmra.mrb[32].mxu0 %vm1323_vm1, %v1312_v7 }
 0x27b   : > { %2928 = vmatpush3.bf16.msra.mxu0 %v1720_v59 }
 0x27c   : > { %2999 = vmatprep.subr.msk.bf16.mxu0 %vm1734_vm2, %v1721_v24 }
 0x27f   : > { %2930 = vmatpush3.bf16.msra.mxu0 %v1736_v25 }
 0x280   : > { %2943 = vmatprep.subr.bf16.mxu0 %v3535_v9 }
 0x32d   : > { %v2901_v23 = vpop.f32.mrb[24].mxu0 }
 0x32e   : > { %v1569_v26 = vsel %vm1566_vm3, %v2901_v23, -1e+30  ;;  %v1370_v27 = vpop.f32.mrb[25].mxu0 }
 0x32f   : > { %v2902_v16 = vpop.f32.mrb[26].mxu0  ;;  %v1586_v28 = vsel %vm1579_vm4, %v1569_v26, -inf  ;;  %v1567_v29 = vsel %vm1566_vm3, %v1370_v27, -1e+30 }
 0x330   : > { %1587 = vmax.xlane.f32.xlu0 %v1586_v28  ;;  %v1373_v30 = vpop.f32.mrb[27].mxu0  ;;  %v1580_v33 = vsel %vm1579_vm4, %v1567_v29, -inf }
 0x331   : > { %v1568_v31 = vsel %vm1566_vm3, %v1373_v30, -1e+30 }
 0x332   : > { %v1583_v32 = vsel %vm1579_vm4, %v1568_v31, -inf }
 0x333   : > { %1584 = vmax.xlane.f32.xlu1 %v1583_v32 }
 0x334   : > { %1581 = vmax.xlane.f32.xlu0 %v1580_v33 }
 0x336   : > { %v2925_v34 = vpop.f32.mrb[24].mxu1 }
 0x337   : > { %v1550_v35 = vpop.f32.mrb[25].mxu1  ;;  %v3588_v59 = vsel %vm1566_vm3, %v2925_v34, -1e+30 }
 0x338   : > { %v2926_v36 = vpop.f32.mrb[26].mxu1  ;;  %v1576_v48 = vsel %vm1566_vm3, %v1550_v35, -1e+30  ;;  %v1613_v62 = vsel %vm1579_vm4, %v3588_v59, -inf }
 0x339   : > { %v1553_v37 = vpop.f32.mrb[27].mxu1  ;;  %v1607_v49 = vsel %vm1579_vm4, %v1576_v48, -inf }
 0x33a   : > { %v3593_v61 = vsel %vm1566_vm3, %v1553_v37, -1e+30 }
 0x33b   : > { %v1610_v63 = vsel %vm1579_vm4, %v3593_v61, -inf }
 0x33d   : > { %v2909_v38 = vpop.f32.mrb[28].mxu0 }
 0x33e   : > { %v1572_v39 = vsel %vm1566_vm3, %v2909_v38, -1e+30  ;;  %v1430_v40 = vpop.f32.mrb[29].mxu0 }
 0x33f   : > { %v2910_v41 = vpop.f32.mrb[30].mxu0  ;;  %v1595_v42 = vsel %vm1579_vm4, %v1572_v39, -inf  ;;  %v1570_v43 = vsel %vm1566_vm3, %v1430_v40, -1e+30 }
 0x340   : > { %1596 = vmax.xlane.f32.xlu1 %v1595_v42  ;;  %v1433_v44 = vpop.f32.mrb[31].mxu0  ;;  %v1589_v47 = vsel %vm1579_vm4, %v1570_v43, -inf }
 0x341   : > { %v1571_v45 = vsel %vm1566_vm3, %v1433_v44, -1e+30 }
 0x342   : > { %v1592_v46 = vsel %vm1579_vm4, %v1571_v45, -inf }
 0x343   : > { %1593 = vmax.xlane.f32.xlu0 %v1592_v46 }
 0x344   : > { %1590 = vmax.xlane.f32.xlu1 %v1589_v47 }
 0x348   : > { %1608 = vmax.xlane.f32.xlu1 %v1607_v49 }
 0x34d   : > { %v2917_v50 = vpop.f32.mrb[32].mxu0 }
 0x34e   : > { %v1575_v51 = vsel %vm1566_vm3, %v2917_v50, -1e+30  ;;  %v1490_v52 = vpop.f32.mrb[33].mxu0 }
 0x34f   : > { %v2918_v53 = vpop.f32.mrb[34].mxu0  ;;  %v1604_v54 = vsel %vm1579_vm4, %v1575_v51, -inf  ;;  %v3580_v55 = vsel %vm1566_vm3, %v1490_v52, -1e+30 }
 0x350   : > { %1605 = vmax.xlane.f32.xlu0 %v1604_v54  ;;  %v1493_v56 = vpop.f32.mrb[35].mxu0  ;;  %v1598_v60 = vsel %vm1579_vm4, %v3580_v55, -inf }
 0x351   : > { %v3583_v57 = vsel %vm1566_vm3, %v1493_v56, -1e+30 }
 0x352   : > { %v1601_v58 = vsel %vm1579_vm4, %v3583_v57, -inf }
 0x353   : > { %1602 = vmax.xlane.f32.xlu1 %v1601_v58 }
 0x354   : > { %1599 = vmax.xlane.f32.xlu0 %v1598_v60 }
 0x357   : > { %1614 = vmax.xlane.f32.xlu1 %v1613_v62 }
 0x358   : > { %1611 = vmax.xlane.f32.xlu0 %v1610_v63 }
 0x3bd   : > { %v1588_v0 = vpop.xlane.xlu0 %1587 }
 0x3be   : > { %v1618_v3 = vsub.f32 %v1569_v26, %v1588_v0 }
 0x3c0   : > { %v1632_v4 = vmul.f32 1.442695, %v1618_v3  ;;  %v1585_v5 = vpop.xlane.xlu1 %1584 }
 0x3c1   : > { %v1617_v6 = vsub.f32 %v1568_v31, %v1585_v5  ;;  %v1582_v8 = vpop.xlane.xlu0 %1581 }
 0x3c2   : > { %3094 = vpow2.f32 %v1632_v4  ;;  %v1616_v10 = vsub.f32 %v1567_v29, %v1582_v8 }
 0x3c3   : > { %v1630_v11 = vmul.f32 1.442695, %v1617_v6 }
 0x3c4   : > { %v1628_v13 = vmul.f32 1.442695, %v1616_v10 }
 0x3c5   : > { %3096 = vpow2.f32 %v1630_v11 }
 0x3c6   : > { %3098 = vpow2.f32 %v1628_v13 }
 0x3cc   : > { %v3599_v14 = vpop.eup %3094 }
 0x3cd   : > { %v1597_v15 = vpop.xlane.xlu1 %1596  ;;  %v1658_v19 = vsel %vm1579_vm4, %v3599_v14, 0.0 }
 0x3ce   : > { %v1621_v17 = vsub.f32 %v1572_v39, %v1597_v15  ;;  %1659 = vadd.xlane.f32.xlu0 %v1658_v19 }
 0x3cf   : > { %v3603_v20 = vpop.eup %3096 }
 0x3d0   : > { %v3605_v21 = vpop.eup %3098  ;;  %v1638_v7 = vmul.f32 1.442695, %v1621_v17  ;;  %v1594_v24 = vpop.xlane.xlu0 %1593  ;;  %v1655_v25 = vsel %vm1579_vm4, %v3603_v20, 0.0 }
 0x3d1   : > { %v1620_v18 = vsub.f32 %v1571_v45, %v1594_v24  ;;  %v1591_v22 = vpop.xlane.xlu1 %1590  ;;  %1656 = vadd.xlane.f32.xlu1 %v1655_v25  ;;  %v1652_v23 = vsel %vm1579_vm4, %v3605_v21, 0.0  ;;  %v1725_v25 = vpack.c.bf16 %v3530_v1, %v3530_v1 }
 0x3d2   : > { %3100 = vpow2.f32 %v1638_v7  ;;  %v1619_v26 = vsub.f32 %v1570_v43, %v1591_v22  ;;  %1653 = vadd.xlane.f32.xlu0 %v1652_v23 }
 0x3d3   : > { %v1636_v27 = vmul.f32 1.442695, %v1620_v18 }
 0x3d4   : > { %v1634_v16 = vmul.f32 1.442695, %v1619_v26 }
 0x3d5   : > { %3102 = vpow2.f32 %v1636_v27  ;;  %v1609_v28 = vpop.xlane.xlu1 %1608 }
 0x3d6   : > { %3104 = vpow2.f32 %v1634_v16  ;;  %v1625_v29 = vsub.f32 %v1576_v48, %v1609_v28 }
 0x3d8   : > { %v1646_v30 = vmul.f32 1.442695, %v1625_v29 }
 0x3da   : > { %3106 = vpow2.f32 %v1646_v30  ;;  %v1727_v30 = vpack.c.bf16 %v3533_v2, %v3533_v2 }
 0x3dc   : > { %v3611_v31 = vpop.eup %3100 }
 0x3dd   : > { %v1606_v32 = vpop.xlane.xlu0 %1605  ;;  %v1667_v33 = vsel %vm1579_vm4, %v3611_v31, 0.0 }
 0x3de   : > { %v1624_v34 = vsub.f32 %v1575_v51, %v1606_v32  ;;  %1668 = vadd.xlane.f32.xlu1 %v1667_v33  ;;  %v1907_v33 = vsel %vm1734_vm2, %v1727_v30, 0 }
 0x3df   : > { %v3615_v35 = vpop.eup %3102 }
 0x3e0   : > { %v3617_v36 = vpop.eup %3104  ;;  %v1644_v37 = vmul.f32 1.442695, %v1624_v34  ;;  %v1603_v38 = vpop.xlane.xlu1 %1602  ;;  %v1664_v39 = vsel %vm1579_vm4, %v3615_v35, 0.0 }
 0x3e1   : > { %v1623_v40 = vsub.f32 %v3583_v57, %v1603_v38  ;;  %1665 = vadd.xlane.f32.xlu0 %v1664_v39  ;;  %v1600_v41 = vpop.xlane.xlu0 %1599  ;;  %v1661_v42 = vsel %vm1579_vm4, %v3617_v36, 0.0 }
 0x3e2   : > { %3108 = vpow2.f32 %v1644_v37  ;;  %v1622_v43 = vsub.f32 %v3580_v55, %v1600_v41  ;;  %1662 = vadd.xlane.f32.xlu1 %v1661_v42 }
 0x3e3   : > { %v1642_v44 = vmul.f32 1.442695, %v1623_v40 }
 0x3e4   : > { %v3625_v45 = vpop.eup %3106  ;;  %v1640_v46 = vmul.f32 1.442695, %v1622_v43  ;;  %v1615_v47 = vpop.xlane.xlu1 %1614 }
 0x3e5   : > { %3110 = vpow2.f32 %v1642_v44  ;;  %v1627_v48 = vsub.f32 %v3588_v59, %v1615_v47  ;;  %v1612_v49 = vpop.xlane.xlu0 %1611  ;;  %v1679_v50 = vsel %vm1579_vm4, %v3625_v45, 0.0 }
 0x3e6   : > { %3112 = vpow2.f32 %v1640_v46  ;;  %v1626_v51 = vsub.f32 %v3593_v61, %v1612_v49  ;;  %1680 = vadd.xlane.f32.xlu1 %v1679_v50  ;;  %v1965_v49 = vld [vmem:[%s3841_s6] sm:$0xf] }
 0x3e7   : > { %v1650_v52 = vmul.f32 1.442695, %v1627_v48  ;;  %v1976_v50 = vsel %vm1734_vm2, %v1965_v49, 0 }
 0x3e8   : > { %v1648_v53 = vmul.f32 1.442695, %v1626_v51 }
 0x3e9   : > { %3114 = vpow2.f32 %v1650_v52  ;;  %v1967_v52 = vld [vmem:[%s3841_s6 + $0x8] sm:$0xf] }
 0x3ea   : > { %3116 = vpow2.f32 %v1648_v53  ;;  %v1968_v53 = vld [vmem:[%s3841_s6 + $0xc] sm:$0xf] }
 0x3ec   : > { %v3631_v54 = vpop.eup %3108 }
 0x3ed   : > { %v1676_v55 = vsel %vm1579_vm4, %v3631_v54, 0.0 }
 0x3ee   : > { %1677 = vadd.xlane.f32.xlu0 %v1676_v55 }
 0x3ef   : > { %v3635_v56 = vpop.eup %3110 }
 0x3f0   : > { %v3637_v57 = vpop.eup %3112  ;;  %v1673_v58 = vsel %vm1579_vm4, %v3635_v56, 0.0 }
 0x3f1   : > { %1674 = vadd.xlane.f32.xlu1 %v1673_v58  ;;  %v1670_v59 = vsel %vm1579_vm4, %v3637_v57, 0.0 }
 0x3f2   : > { %1671 = vadd.xlane.f32.xlu0 %v1670_v59 }
 0x3f3   : > { %v3643_v60 = vpop.eup %3114 }
 0x3f4   : > { %v3645_v61 = vpop.eup %3116  ;;  %v1685_v62 = vsel %vm1579_vm4, %v3643_v60, 0.0 }
 0x3f5   : > { %1686 = vadd.xlane.f32.xlu1 %v1685_v62  ;;  %v1682_v63 = vsel %vm1579_vm4, %v3645_v61, 0.0 }
 0x3f6   : > { %1683 = vadd.xlane.f32.xlu0 %v1682_v63 }
 0x45b   : > { %v1660_v0 = vpop.xlane.xlu0 %1659 }
 0x45c   : > { %3118 = vrcp.f32 %v1660_v0 }
 0x45e   : > { %v1657_v3 = vpop.xlane.xlu1 %1656 }
 0x45f   : > { %3120 = vrcp.f32 %v1657_v3  ;;  %v1654_v4 = vpop.xlane.xlu0 %1653 }
 0x460   : > { %3122 = vrcp.f32 %v1654_v4 }
 0x466   : > { %v3119_v5 = vpop.eup %3118 }
 0x467   : > { %v1702_v10 = vmul.f32 %v3119_v5, %v3599_v14  ;;  %v1850_v14 = vsel %vm1734_vm2, %v1725_v25, 0  ;;  %v2147_v5 = vsel %vm1734_vm2, %v1968_v53, 0 }
 0x469   : > { %v3121_v6 = vpop.eup %3120  ;;  %v1713_v7 = vpack.c.bf16 %v1702_v10, %v1702_v10 }
 0x46a   : > { %v3123_v8 = vpop.eup %3122  ;;  %v1701_v11 = vmul.f32 %v3121_v6, %v3603_v20 }
 0x46b   : > { %v1669_v13 = vpop.xlane.xlu1 %1668  ;;  %v1700_v15 = vmul.f32 %v3123_v8, %v3605_v21 }
 0x46c   : > { %3124 = vrcp.f32 %v1669_v13 }
 0x46d   : > { %v1712_v19 = vpack.c.bf16 %v1701_v11, %v1700_v15 }
 0x46e   : > { %v1666_v17 = vpop.xlane.xlu0 %1665 }
 0x46f   : > { %3126 = vrcp.f32 %v1666_v17  ;;  %2931 = vmatprep.mubr.msk.bf16.mxu0 %vm1579_vm4, %v1712_v19  ;;  %v1663_v24 = vpop.xlane.xlu1 %1662 }
 0x470   : > { %3128 = vrcp.f32 %v1663_v24  ;;  %2932 = vmatmul.mubr.msk.bf16.vlgmr.msra.gmra.mrb[36].mxu0 %vm1579_vm4, %v1713_v7 }
 0x471   : > { %2944 = vmatpush3.bf16.msra.mxu0 %v3535_v9 }
 0x472   : > { %3001 = vmatprep.subr.msk.bf16.mxu0 %vm1734_vm2, %v1725_v25 }
 0x473   : > { %v1681_v23 = vpop.xlane.xlu1 %1680 }
 0x475   : > { %2946 = vmatpush3.bf16.msra.mxu0 %v1850_v14 }
 0x476   : > { %v3125_v20 = vpop.eup %3124  ;;  %3003 = vmatprep.subr.msk.bf16.mxu0 %vm1734_vm2, %v1965_v49 }
 0x477   : > { %v1705_v22 = vmul.f32 %v3125_v20, %v3611_v31 }
 0x479   : > { %v3127_v21 = vpop.eup %3126  ;;  %v1715_v9 = vpack.c.bf16 %v1705_v22, %v1705_v22 }
 0x47a   : > { %v3129_v18 = vpop.eup %3128  ;;  %v1704_v26 = vmul.f32 %v3127_v21, %v3615_v35 }
 0x47b   : > { %v1678_v27 = vpop.xlane.xlu0 %1677  ;;  %v1703_v1 = vmul.f32 %v3129_v18, %v3617_v36 }
 0x47c   : > { %3130 = vrcp.f32 %v1678_v27 }
 0x47d   : > { %v1714_v16 = vpack.c.bf16 %v1704_v26, %v1703_v1 }
 0x47e   : > { %v1675_v28 = vpop.xlane.xlu1 %1674 }
 0x47f   : > { %3132 = vrcp.f32 %v1675_v28  ;;  %v1672_v29 = vpop.xlane.xlu0 %1671  ;;  %2939 = vmatprep.mubr.msk.bf16.mxu1 %vm1579_vm4, %v1714_v16 }
 0x480   : > { %3134 = vrcp.f32 %v1672_v29  ;;  %2940 = vmatmul.mubr.msk.bf16.vlgmr.msra.gmra.mrb[28].mxu1 %vm1579_vm4, %v1715_v9 }
 0x481   : > { %2952 = vmatpush3.bf16.msra.mxu1 %v3539_v12  ;;  %3136 = vrcp.f32 %v1681_v23 }
 0x482   : > { %3002 = vmatprep.subr.msk.bf16.mxu1 %vm1734_vm2, %v1727_v30  ;;  %v1687_v31 = vpop.xlane.xlu1 %1686 }
 0x483   : > { %3138 = vrcp.f32 %v1687_v31  ;;  %v1684_v32 = vpop.xlane.xlu0 %1683 }
 0x484   : > { %3140 = vrcp.f32 %v1684_v32 }
 0x485   : > { %2954 = vmatpush3.bf16.msra.mxu1 %v1907_v33 }
 0x486   : > { %v3131_v34 = vpop.eup %3130 }
 0x487   : > { %v1708_v2 = vmul.f32 %v3131_v34, %v3631_v54 }
 0x489   : > { %v3133_v35 = vpop.eup %3132  ;;  %v1717_v43 = vpack.c.bf16 %v1708_v2, %v1708_v2 }
 0x48a   : > { %v3135_v36 = vpop.eup %3134  ;;  %v1707_v37 = vmul.f32 %v3133_v35, %v3635_v56 }
 0x48b   : > { %v1706_v38 = vmul.f32 %v3135_v36, %v3637_v57  ;;  %v3137_v12 = vpop.eup %3136 }
 0x48c   : > { %v1709_v44 = vmul.f32 %v3137_v12, %v3625_v45  ;;  %v1966_v45 = vld [vmem:[%s3841_s6 + $0x4] sm:$0xf] }
 0x48d   : > { %v3139_v39 = vpop.eup %3138  ;;  %v1716_v40 = vpack.c.bf16 %v1707_v37, %v1706_v38  ;;  %3004 = vmatprep.subr.msk.bf16.mxu1 %vm1734_vm2, %v1966_v45  ;;  %v2033_v51 = vsel %vm1734_vm2, %v1966_v45, 0 }
 0x48e   : > { %v3141_v41 = vpop.eup %3140  ;;  %v1711_v42 = vmul.f32 %v3139_v39, %v3643_v60  ;;  %v2090_v60 = vsel %vm1734_vm2, %v1967_v52, 0 }
 0x48f   : > { %2947 = vmatprep.mubr.msk.bf16.mxu0 %vm1579_vm4, %v1716_v40  ;;  %v1710_v46 = vmul.f32 %v3141_v41, %v3645_v61 }
 0x490   : > { %2948 = vmatmul.mubr.msk.bf16.vlgmr.msra.gmra.mrb[40].mxu0 %vm1579_vm4, %v1717_v43  ;;  %v1719_v48 = vpack.c.bf16 %v1711_v42, %v1711_v42 }
 0x491   : > { %v1718_v47 = vpack.c.bf16 %v1710_v46, %v1709_v44  ;;  %2960 = vmatpush3.bf16.msra.mxu0 %v1976_v50 }
 0x492   : > { %3005 = vmatprep.subr.msk.bf16.mxu0 %vm1734_vm2, %v1967_v52 }
 0x493   : > { %2955 = vmatprep.mubr.msk.bf16.mxu1 %vm1579_vm4, %v1718_v47 }
 0x494   : > { %2956 = vmatmul.mubr.msk.bf16.vlgmr.msra.gmra.mrb[32].mxu1 %vm1579_vm4, %v1719_v48  ;;  %v2679_v48 = vld [vmem:[%s3842_s7] ss:$0 sm:$0xff] }
 0x495   : > { %2966 = vmatpush3.bf16.msra.mxu1 %v2033_v51 }
 0x496   : > { %3006 = vmatprep.subr.msk.bf16.mxu1 %vm1734_vm2, %v1968_v53 }
 0x543   : > { %v2933_v54 = vpop.f32.mrb[36].mxu0 }
 0x544   : > { %v1772_v55 = vpop.f32.mrb[37].mxu0  ;;  %v1958_v59 = vpack.c.bf16 %v2933_v54, %v2933_v54 }
 0x545   : > { %v2934_v56 = vpop.f32.mrb[38].mxu0 }
 0x546   : > { %v1775_v57 = vpop.f32.mrb[39].mxu0 }
 0x547   : > { %v1957_v58 = vpack.c.bf16 %v1775_v57, %v1772_v55  ;;  %v3154_v57 = vld [vmem:[%s3353_s18] sm:$0xff] }
 0x549   : > { %2961 = vmatprep.mubr.msk.bf16.mxu0 %vm1323_vm1, %v1957_v58 }
 0x54a   : > { %2962 = vmatmul.mubr.msk.bf16.vlgmr.msra.gmra.mrb[44].mxu0 %vm1323_vm1, %v1958_v59 }
 0x54b   : > { %2972 = vmatpush3.bf16.msra.mxu0 %v2090_v60  ;;  %v3155_v60 = vld [vmem:[%s3353_s18 + $0x8] sm:$0xff] }
 0x553   : > { %v2941_v61 = vpop.f32.mrb[28].mxu1 }
 0x554   : > { %v1829_v62 = vpop.f32.mrb[29].mxu1  ;;  %v1960_v4 = vpack.c.bf16 %v2941_v61, %v2941_v61 }
 0x555   : > { %v2942_v63 = vpop.f32.mrb[30].mxu1 }
 0x556   : > { %v1832_v0 = vpop.f32.mrb[31].mxu1 }
 0x557   : > { %v1959_v3 = vpack.c.bf16 %v1832_v0, %v1829_v62  ;;  %v3156_v62 = vld [vmem:[%s3353_s18 + $0x10] sm:$0xff]  ;;  %s3009_s18 = smul.u32 384, %s3321_s17  ;;  %s3222_s17 = smov [#allocation2]  }
 0x558   : > { %s3161_s1 = sshll.u32 %s3222_s17, 4  ;;  %s3162_s1 = int_to_ptr.vmem [resolvable:$false] %s3161_s1 }
 0x559   : > { %2967 = vmatprep.mubr.msk.bf16.mxu1 %vm1323_vm1, %v1959_v3  ;;  %s3792_s25 = scalar_lea.hbm %s3849_s14, %s3009_s18  ;;  %s3163_s2 = scalar_lea.vmem %s3162_s1, 768 }
 0x55a   : > { %2968 = vmatmul.mubr.msk.bf16.vlgmr.msra.gmra.mrb[36].mxu1 %vm1323_vm1, %v1960_v4  ;;  %p3164_p0 = scmp.lt.s32.totalorder %s3787_s22, %s3162_s1  ;;  %p3165_p1 = scmp.lt.s32.totalorder %s3163_s2, %s3157_s26 }
 0x55b   : > { %2978 = vmatpush3.bf16.msra.mxu1 %v2147_v5 }
 0x55c   : > { %p3166_p2 = por %p3165_p1, %p3164_p0 }
 0x55e   : > { %p3167_p3 = pnand %p3166_p2, %p3160_p13 }
 0x563   : > { %v2949_v6 = vpop.f32.mrb[40].mxu0 }
 0x564   : > { %v1886_v8 = vpop.f32.mrb[41].mxu0  ;;  %v1962_v19 = vpack.c.bf16 %v2949_v6, %v2949_v6 }
 0x565   : > { %v2950_v10 = vpop.f32.mrb[42].mxu0 }
 0x566   : > { %v1889_v11 = vpop.f32.mrb[43].mxu0 }
 0x567   : > { %v1961_v13 = vpack.c.bf16 %v1889_v11, %v1886_v8  ;;  %v2957_v15 = vpop.f32.mrb[32].mxu1 }
 0x568   : > { %v1943_v17 = vpop.f32.mrb[33].mxu1  ;;  %v1964_v14 = vpack.c.bf16 %v2957_v15, %v2957_v15 }
 0x569   : > { %v2958_v7 = vpop.f32.mrb[34].mxu1  ;;  %2973 = vmatprep.mubr.msk.bf16.mxu0 %vm1323_vm1, %v1961_v13 }
 0x56a   : > { %v1946_v24 = vpop.f32.mrb[35].mxu1  ;;  %2974 = vmatmul.mubr.msk.bf16.vlgmr.msra.gmra.mrb[48].mxu0 %vm1323_vm1, %v1962_v19 }
 0x56b   : > { %v1963_v25 = vpack.c.bf16 %v1946_v24, %v1943_v17 }
 0x56d   : > { %2979 = vmatprep.mubr.msk.bf16.mxu1 %vm1323_vm1, %v1963_v25 }
 0x56e   : > { %2980 = vmatmul.mubr.msk.bf16.vlgmr.msra.gmra.mrb[40].mxu1 %vm1323_vm1, %v1964_v14 }
 0x61d   : > { %v2963_v20 = vpop.f32.mrb[44].mxu0 }
 0x61e   : > { %v2012_v21 = vpop.f32.mrb[45].mxu0  ;;  %v2211_v26 = vsel %vm472_vm0, %v2963_v20, 0.0 }
 0x61f   : > { %v2964_v18 = vpop.f32.mrb[46].mxu0  ;;  %v2197_v16 = vsel %vm472_vm0, %v2012_v21, 0.0  ;;  %v3076_v21 = vld [vmem:[%s3845_s10] sm:$0xff]  }
 0x620   : > { %v2015_v22 = vpop.f32.mrb[47].mxu0  ;;  %2983 = vmatprep.subr.bf16.mxu0 %v3076_v21  ;;  %v3077_v18 = vld [vmem:[%s3845_s10 + $0x8] sm:$0xff]  }
 0x621   : > { %v2204_v32 = vsel %vm472_vm0, %v2015_v22, 0.0  ;;  %2984 = vmatpush3.bf16.msra.mxu0 %v3076_v21  ;;  %v3078_v22 = vld [vmem:[%s3847_s12] sm:$0xff]  }
 0x622   : > { %2985 = vmatprep.subr.bf16.mxu0 %v3077_v18 }
 0x625   : > { %2986 = vmatpush3.bf16.msra.mxu0 %v3077_v18 }
 0x62d   : > { %v2969_v23 = vpop.f32.mrb[36].mxu1 }
 0x62e   : > { %v2212_v27 = vsel %vm472_vm0, %v2969_v23, 0.0  ;;  %v2069_v1 = vpop.f32.mrb[37].mxu1  ;;  %v3221_v23 = vmov 0  }
 0x62f   : > { %v2213_v28 = vadd.f32 %v2212_v27, %v2211_v26  ;;  %v2198_v9 = vsel %vm472_vm0, %v2069_v1, 0.0  ;;  %v2970_v29 = vpop.f32.mrb[38].mxu1  ;;  %2473 = vmatprep.subr.bf16.mxu1 %v3221_v23  ;;  %v3079_v26 = vld [vmem:[%s3847_s12 + $0x8] sm:$0xff]   ;;  %v3080_v27 = vld [vmem:[%s3847_s12 + $0x10] sm:$0xff]   ;;  %v3081_v1 = vld [vmem:[%s3847_s12 + $0x18] sm:$0xff]  }
 0x630   : > { %v2199_v30 = vadd.f32 %v2198_v9, %v2197_v16  ;;  %v2072_v31 = vpop.f32.mrb[39].mxu1  ;;  %2474 = vmatpush1.bf16.msra.mxu1 %v3078_v22 }
 0x631   : > { %v2205_v33 = vsel %vm472_vm0, %v2072_v31, 0.0  ;;  %2475 = vmatprep.subr.bf16.mxu1 %v3221_v23 }
 0x632   : > { %v2206_v34 = vadd.f32 %v2205_v33, %v2204_v32 }
 0x634   : > { %2476 = vmatpush1.bf16.msra.mxu1 %v3079_v26 }
 0x635   : > { %2477 = vmatprep.subr.bf16.mxu1 %v3221_v23 }
 0x638   : > { %2478 = vmatpush1.bf16.msra.mxu1 %v3080_v27 }
 0x639   : > { %2479 = vmatprep.subr.bf16.mxu1 %v3221_v23 }
 0x63c   : > { %2480 = vmatpush1.bf16.msra.mxu1 %v3081_v1 }
 0x63d   : > { %v2975_v35 = vpop.f32.mrb[48].mxu0  ;;  %2481 = vmatprep.subr.bf16.mxu1 %v3221_v23 }
 0x63e   : > { %v2214_v36 = vsel %vm472_vm0, %v2975_v35, 0.0  ;;  %v2126_v2 = vpop.f32.mrb[49].mxu0 }
 0x63f   : > { %v2215_v37 = vadd.f32 %v2214_v36, %v2213_v28  ;;  %v2200_v38 = vsel %vm472_vm0, %v2126_v2, 0.0  ;;  %v2976_v12 = vpop.f32.mrb[50].mxu0  ;;  %v2680_v36 = vld [vmem:[%s3843_s8] ss:$0 sm:$0xff] }
 0x640   : > { %v2201_v39 = vadd.f32 %v2200_v38, %v2199_v30  ;;  %v2129_v40 = vpop.f32.mrb[51].mxu0 }
 0x641   : > { %v2207_v41 = vsel %vm472_vm0, %v2129_v40, 0.0  ;;  %v2981_v42 = vpop.f32.mrb[40].mxu1  ;;  %v2681_v40 = vld [vmem:[%s3844_s9] ss:$0 sm:$0xff] }
 0x642   : > { %v2208_v43 = vadd.f32 %v2207_v41, %v2206_v34  ;;  %v2216_v44 = vsel %vm472_vm0, %v2981_v42, 0.0  ;;  %v2183_v46 = vpop.f32.mrb[41].mxu1 }
 0x643   : > { %v2217_v47 = vadd.f32 %v2216_v44, %v2215_v37  ;;  %v2202_v49 = vsel %vm472_vm0, %v2183_v46, 0.0  ;;  %v2982_v50 = vpop.f32.mrb[42].mxu1 }
 0x644   : > { %v2203_v45 = vadd.f32 %v2202_v49, %v2201_v39  ;;  %v2186_v51 = vpop.f32.mrb[43].mxu1  ;;  %v3082_v50 = vld [vmem:[%s3847_s12 + $0x20] sm:$0xff]  }
 0x645   : > { %v2209_v52 = vsel %vm472_vm0, %v2186_v51, 0.0  ;;  %v2227_v53 = vadd.f32 %v2679_v48, %v2217_v47  ;;  %2482 = vmatpush1.bf16.msra.mxu1 %v3082_v50  ;;  %v3084_v51 = vld [vmem:[%s3847_s12 + $0x30] sm:$0xff]  }
 0x646   : > { %v2225_v54 = vadd.f32 %v2679_v48, %v2203_v45  ;;  %v2210_v55 = vadd.f32 %v2209_v52, %v2208_v43  ;;  %2483 = vmatprep.subr.bf16.mxu1 %v3221_v23  ;;  %v3083_v45 = vld [vmem:[%s3847_s12 + $0x28] sm:$0xff]   ;;  %v3085_v52 = vld [vmem:[%s3847_s12 + $0x38] sm:$0xff]  }
 0x647   : > { %v2230_v63 = vadd.f32 %v3156_v62, %v2227_v53  ;;  %v3086_v53 = vld [vmem:[%s3847_s12 + $0x40] sm:$0xff]  }
 0x648   : > { %v2226_v56 = vadd.f32 %v2679_v48, %v2210_v55  ;;  %v2228_v58 = vadd.f32 %v3154_v57, %v2225_v54  ;;  %v3087_v54 = vld [vmem:[%s3847_s12 + $0x48] sm:$0xff]   ;;  %v2682_v55 = vld [vmem:[%s3846_s11] ss:$0 sm:$0xff] }
 0x649   : > { %v2239_v3 = vsel %vm472_vm0, %v2230_v63, 0.0  ;;  %2484 = vmatpush1.bf16.msra.mxu1 %v3083_v45 }
 0x64a   : > { %v2233_v59 = vsel %vm472_vm0, %v2228_v58, 0.0  ;;  %v2229_v61 = vadd.f32 %v3155_v60, %v2226_v56  ;;  %2485 = vmatprep.subr.bf16.mxu1 %v3221_v23 }
 0x64b   : > { %2234 = vadd.xlane.f32.xlu0 %v2233_v59 }
 0x64c   : > { %v2236_v0 = vsel %vm472_vm0, %v2229_v61, 0.0 }
 0x64d   : > { %2237 = vadd.xlane.f32.xlu1 %v2236_v0  ;;  %2486 = vmatpush1.bf16.msra.mxu1 %v3084_v51 }
 0x64e   : > { %2487 = vmatprep.subr.bf16.mxu1 %v3221_v23 }
 0x64f   : > { %2240 = vadd.xlane.f32.xlu0 %v2239_v3 }
 0x651   : > { %2488 = vmatpush1.bf16.msra.mxu1 %v3085_v52 }
 0x652   : > { %2489 = vmatprep.subr.bf16.mxu1 %v3221_v23 }
 0x655   : > { %2490 = vmatpush1.bf16.msra.mxu1 %v3086_v53 }
 0x656   : > { %2491 = vmatprep.subr.bf16.mxu1 %v3221_v23 }
 0x659   : > { %2492 = vmatpush1.bf16.msra.mxu1 %v3087_v54 }
 0x6d8   : > { %v2235_v4 = vpop.xlane.xlu0 %2234 }
 0x6d9   : > { %v2242_v5 = vmul.f32 0.03125, %v2235_v4 }
 0x6da   : > { %v2238_v6 = vpop.xlane.xlu1 %2237 }
 0x6db   : > { %v2245_v8 = vsub.f32 %v2228_v58, %v2242_v5  ;;  %v2243_v10 = vmul.f32 0.03125, %v2238_v6 }
 0x6dc   : > { %v2241_v11 = vpop.xlane.xlu0 %2240 }
 0x6dd   : > { %v2246_v13 = vsub.f32 %v2229_v61, %v2243_v10  ;;  %v2244_v15 = vmul.f32 0.03125, %v2241_v11  ;;  %v2248_v19 = vmul.f32 %v2245_v8, %v2245_v8 }
 0x6df   : > { %v2247_v17 = vsub.f32 %v2230_v63, %v2244_v15  ;;  %v2251_v7 = vsel %vm472_vm0, %v2248_v19, 0.0  ;;  %v2249_v24 = vmul.f32 %v2246_v13, %v2246_v13 }
 0x6e0   : > { %2252 = vadd.xlane.f32.xlu1 %v2251_v7 }
 0x6e1   : > { %v2254_v25 = vsel %vm472_vm0, %v2249_v24, 0.0  ;;  %v2250_v14 = vmul.f32 %v2247_v17, %v2247_v17 }
 0x6e2   : > { %2255 = vadd.xlane.f32.xlu0 %v2254_v25 }
 0x6e3   : > { %v2257_v20 = vsel %vm472_vm0, %v2250_v14, 0.0 }
 0x6e4   : > { %2258 = vadd.xlane.f32.xlu1 %v2257_v20  ;;  %v2687_v20 = vld [vmem:[%s3848_s13] ss:$0 sm:$0xff] }
 0x76d   : > { %v2253_v16 = vpop.xlane.xlu1 %2252 }
 0x76e   : > { %v2260_v28 = vmul.f32 0.03125, %v2253_v16 }
 0x76f   : > { %v2256_v9 = vpop.xlane.xlu0 %2255 }
 0x770   : > { %v2263_v29 = vadd.f32 1e-05, %v2260_v28  ;;  %v2261_v30 = vmul.f32 0.03125, %v2256_v9 }
 0x771   : > { %v2259_v31 = vpop.xlane.xlu1 %2258 }
 0x772   : > { %3142 = vrsqrt.f32 %v2263_v29  ;;  %v2264_v32 = vadd.f32 1e-05, %v2261_v30  ;;  %v2262_v33 = vmul.f32 0.03125, %v2259_v31 }
 0x774   : > { %3144 = vrsqrt.f32 %v2264_v32  ;;  %v2265_v34 = vadd.f32 1e-05, %v2262_v33 }
 0x776   : > { %3146 = vrsqrt.f32 %v2265_v34 }
 0x77c   : > { %v3143_v35 = vpop.eup %3142 }
 0x77d   : > { %v2269_v2 = vmul.f32 %v3143_v35, %v2245_v8 }
 0x77e   : > { %v3145_v37 = vpop.eup %3144 }
 0x77f   : > { %v2270_v38 = vmul.f32 %v3145_v37, %v2246_v13  ;;  %v2278_v12 = vmul.f32 %v2680_v36, %v2269_v2 }
 0x780   : > { %v3147_v39 = vpop.eup %3146 }
 0x781   : > { %v2271_v41 = vmul.f32 %v3147_v39, %v2247_v17  ;;  %v2279_v42 = vmul.f32 %v2680_v36, %v2270_v38  ;;  %v2287_v44 = vadd.f32 %v2681_v40, %v2278_v12 }
 0x783   : > { %v2280_v43 = vmul.f32 %v2680_v36, %v2271_v41  ;;  %v2288_v46 = vadd.f32 %v2681_v40, %v2279_v42 }
 0x785   : > { %v2290_v47 = vpack.c.bf16 %v2288_v46, %v2287_v44  ;;  %v2289_v48 = vadd.f32 %v2681_v40, %v2280_v43 }
 0x787   : > { %2987 = vmatprep.mubr.msk.bf16.mxu0 %vm472_vm0, %v2290_v47  ;;  %2698 = vmatprep.mubr.msk.bf16.mxu1 %vm472_vm0, %v2290_v47  ;;  %v2291_v49 = vpack.c.bf16 %v2289_v48, %v2289_v48 }
 0x789   : > { %2988 = vmatmul.mubr.msk.bf16.vlgmr.msra.gmra.mrb[52].mxu0 %vm472_vm0, %v2291_v49 }
 0x85c   : > { %v2989_v56 = vpop.f32.mrb[52].mxu0 }
 0x85d   : > { %v2355_v57 = vpop.f32.mrb[53].mxu0  ;;  %v2364_v58 = vadd.f32 %v2989_v56, %v2682_v55 }
 0x85e   : > { %v2356_v59 = vadd.f32 %v2682_v55, %v2355_v57  ;;  %v2990_v60 = vpop.f32.mrb[54].mxu0 }
 0x85f   : > { %v2358_v61 = vpop.f32.mrb[55].mxu0  ;;  %v2374_v0 = vmul.f32 0.70710677, %v2364_v58  ;;  %v2371_v24 = vmul.f32 0.5, %v2364_v58 }
 0x860   : > { %v2372_v62 = vmul.f32 0.70710677, %v2356_v59  ;;  %v2359_v63 = vadd.f32 %v2682_v55, %v2358_v61  ;;  %v2369_v8 = vmul.f32 0.5, %v2356_v59 }
 0x862   : > { %3148 = verf.f32 %v2372_v62  ;;  %v2373_v3 = vmul.f32 0.70710677, %v2359_v63  ;;  %v2370_v10 = vmul.f32 0.5, %v2359_v63 }
 0x864   : > { %3150 = verf.f32 %v2373_v3 }
 0x865   : > { %3152 = verf.f32 %v2374_v0 }
 0x86c   : > { %v3149_v4 = vpop.eup %3148 }
 0x86d   : > { %v2378_v5 = vadd.f32 1.0, %v3149_v4 }
 0x86e   : > { %v3151_v6 = vpop.eup %3150 }
 0x86f   : > { %v2379_v11 = vadd.f32 1.0, %v3151_v6  ;;  %v3153_v13 = vpop.eup %3152  ;;  %v2381_v15 = vmul.f32 %v2378_v5, %v2369_v8 }
 0x870   : > { %v2380_v17 = vadd.f32 1.0, %v3153_v13 }
 0x871   : > { %v2382_v19 = vmul.f32 %v2379_v11, %v2370_v10 }
 0x872   : > { %v2383_v25 = vmul.f32 %v2380_v17, %v2371_v24 }
 0x873   : > { %v2384_v7 = vpack.c.bf16 %v2382_v19, %v2381_v15 }
 0x874   : > { %v2385_v14 = vpack.c.bf16 %v2383_v25, %v2383_v25 }
 0x875   : > { %2506 = vmatmul.mubr.bf16.vlgmr.msra.gmra.mrb[44].mxu1 %v2384_v7 }
 0x876   : > { %2699 = vmatprep.mubr.msk.bf16.mxu1 %vm472_vm0, %v2291_v49 }
 0x87d   : > { %2514 = vmatmul.mubr.bf16.gmra.mrb[48].mxu1 %v2385_v14 }
 0x948   : > { %v2507_v21 = vpop.f32.mrb[44].mxu1 }
 0x949   : > { %v2508_v18 = vadd.f32 %v2687_v20, %v2507_v21  ;;  %v2509_v22 = vpop.f32.mrb[45].mxu1 }
 0x94a   : > { %v2510_v23 = vpop.f32.mrb[46].mxu1 }
 0x94b   : > { %2521 = vst [vmem:[%s460_s0] sm:$0xff] %v2508_v18  ;;  %v2511_v26 = vadd.f32 %v2687_v20, %v2510_v23  ;;  %v2512_v27 = vpop.f32.mrb[47].mxu1 }
 0x94d   : > { %2522 = vst [vmem:[%s460_s0 + $0x8] sm:$0xff] %v2511_v26 }
 0x950   : > { %v2515_v1 = vpop.f32.mrb[48].mxu1 }
 0x951   : > { %v2516_v16 = vadd.f32 %v2687_v20, %v2515_v1  ;;  %v2517_v28 = vpop.f32.mrb[49].mxu1 }
 0x952   : > { %v2518_v9 = vpop.f32.mrb[50].mxu1 }
 0x953   : > { %2523 = vst [vmem:[%s460_s0 + $0x10] sm:$0xff] %v2516_v16  ;;  %v2519_v29 = vpop.f32.mrb[51].mxu1 }
 0x954   : > { %3170 = shalt.err (!%p3167_p3)
}
 0x955   : > { %s3171_s20 = scalar_lea.hbm %s3792_s25, 384  ;;  %s3175_s27 = scalar_lea.hbm %s3849_s14, 768 }
 0x956   : > { %p3172_p4 = scmp.ne.s32.totalorder %s3792_s25, %s3171_s20  ;;  %p3176_p9 = scmp.lt.u32.totalorder %s3792_s25, %s3849_s14 }
 0x957   : > { %p3177_p10 = scmp.lt.u32.totalorder %s3175_s27, %s3171_s20  ;;  %p3179_p12 = scmp.lt.u32.totalorder %s3171_s20, %s3792_s25 }
 0x958   : > { %p3173_p7 = pnand %p3172_p4, %p3338_p5 }
 0x959   : > { %p3178_p11 = por %p3177_p10, %p3176_p9 }
 0x95a   : > { %p3174_p8 = pneg %p3173_p7 }
 0x95b   : > { %p3180_p13 = por %p3179_p12, %p3178_p11 }
 0x95d   : > { %p3181_p0 = pnand %p3180_p13, %p3174_p8 }
 0x95f   : > { %3184 = shalt.err (!%p3181_p0)
}
 0x960   : > { %s3223_s2 = smov 128   ;;  %s3224_s26 = smov 8  }
 0x961   : > { %3010 = dma.vmem_to_hbm [thread:$0]  (%p3338_p5), %s3787_s22, 384, %s3792_s25, %s3794_s21, %s3223_s2, %s3223_s2, %s3224_s26  }
 0x962 PF: > { %p3016_p1 = scmp.ge.s32.totalorder %s3219_s16, 2  ;;  %s2553_s17 = sand.u32 1, %s3207_s29  }
 0x963   : > { %s2554_s20 = scalar_lea.sflag [#allocation3], %s2553_s17 }
 0x964   : > { %p3013_p2 = pnand %p3016_p1, %p3342_p6 }
 0x966   : > { %3202 = dma.done.wait (!%p3013_p2), %s2554_s20, 384  }
 0x967   : > { %3204 = vsyncadd (!%p3013_p2), %s2554_s20, 4294966912  ;;  %s3859_s0 = sld [smem:[#allocation5_spill]]  ;;  %p24_p3 = scmp.ge.s32.totalorder %s3325_s19, 4  }
 0x968   : > { %s3860_s29 = smov %s3211_s30  ;;  %s3861_s30 = smov %s3215_s15 }
 0x969   : > { %s3863_s16 = smov %s3325_s19  ;;  %26 = sbr.rel (!%p24_p3) target bundleno = 7 (0x7), region = 111 }
 0x96d   : > { %s3862_s15 = smov %s3859_s0 }
 0x970   :  { %2559 = vsyncpa [#allocation3], 1 }
 0x971   :  { %2561 = vsyncpa [#allocation3 + $0x1], 1 }

</bundles_post_ra>
